<compile_context>
chip_gen: v7x
topology: tpu7x:2x2x1
jax: 0.10.0
libtpu: 0.0.40
codegen_flags: <defaults>
</compile_context>

<pallas_src>
import functools

import jax
import jax.numpy as jnp
import numpy as np
from jax import lax
from jax.experimental import pallas as pl
from jax.experimental.pallas import tpu as pltpu

LANE = 128  # lane-dense logit slab width

_GEN_WEIGHTS = ("W1z", "W1e_eff", "b1", "W2", "b2")
_DISC_WEIGHTS = ("Ed", "Wd1", "bd1", "Wout", "bout")


# ------------------------------ shared in-kernel math -------------------------------

def _one_hot_bf16(labels, k):
    """(tm, 1) int32 labels -> (tm, k) bf16 one-hot, built in-kernel (VPU compare)."""
    iota = lax.broadcasted_iota(jnp.int32, (labels.shape[0], k), 1)
    return (labels == iota).astype(jnp.bfloat16)


def _gen_compute(z, oh, w1z, w1e, b1, w2, b2):
    """2-layer class-conditional generator; hidden stays in vregs (no scratch)."""
    f32 = jnp.float32
    h = jnp.dot(z.astype(jnp.bfloat16), w1z, preferred_element_type=f32)
    h = h + jnp.dot(oh, w1e, preferred_element_type=f32)     # folded class embedding
    h = jnp.maximum(h + b1, 0.0)                              # relu in f32 (VPU)
    img = jnp.dot(h.astype(jnp.bfloat16), w2, preferred_element_type=f32)
    return jnp.tanh(img + b2)                                 # tanh in f32 (EUP)


def _disc_logits(img_f32, oh, ed, wd1, bd1, wout, bout, policy):
    """Projection discriminator on an in-VMEM/vreg image tile -> (tm, 1) f32 logit."""
    f32 = jnp.float32
    x = img_f32
    if policy:
        # TODO(synk): full stochastic DiffAugment (random brightness / saturation /
        # translation / cutout) needs per-sample RNG; only a deterministic
        # brightness+contrast prologue is fused here on the resident tile.
        x = x + 0.1
        mean = jnp.mean(x, axis=-1, keepdims=True)
        x = (x - mean) * 1.2 + mean
    h = jnp.dot(x.astype(jnp.bfloat16), wd1, preferred_element_type=f32) + bd1
    h = jnp.where(h > 0.0, h, 0.2 * h)                        # leaky relu in f32
    emb = jnp.dot(oh, ed, preferred_element_type=f32)         # class embedding (MXU)
    proj = jnp.sum(h * emb, axis=-1, keepdims=True)           # projection term (XLU reduce)
    # Output head as VPU mul + XLU lane reduce against the real (1, hd) row —
    # no zero-padded (hd, 128) MXU matmul, no 128 KiB of zero weight DMA.
    logit = jnp.sum(h * wout.astype(f32), axis=-1, keepdims=True)
    return logit + proj + bout                                # (tm, 1)


# ------------------------------------ kernels ---------------------------------------

def _gan_pair_kernel(policy, k, z_ref, gy_ref, x_ref, dy_ref,
                     w1z_ref, w1e_ref, b1_ref, w2_ref, b2_ref,
                     ed_ref, wd1_ref, bd1_ref, wout_ref, bout_ref,
                     dfake_ref, dreal_ref):
    """Fused generator + pair discriminator. No fake/real concat anywhere: the two
    tiles share the same RHS weights and produce their own logit slabs."""
    tm = z_ref.shape[0]
    oh_g = _one_hot_bf16(gy_ref[...], k)
    oh_d = _one_hot_bf16(dy_ref[...], k)
    gen = _gen_compute(z_ref[...], oh_g, w1z_ref[...], w1e_ref[...], b1_ref[...],
                       w2_ref[...], b2_ref[...])              # stays in VMEM/vregs
    lf = _disc_logits(gen, oh_g, ed_ref[...], wd1_ref[...], bd1_ref[...],
                      wout_ref[...], bout_ref[...], policy)
    lr = _disc_logits(x_ref[...], oh_d, ed_ref[...], wd1_ref[...], bd1_ref[...],
                      wout_ref[...], bout_ref[...], policy)
    dfake_ref[...] = jnp.broadcast_to(lf, (tm, LANE))         # lane-dense unmasked vst
    dreal_ref[...] = jnp.broadcast_to(lr, (tm, LANE))


def _gan_fake_kernel(policy, k, z_ref, gy_ref,
                     w1z_ref, w1e_ref, b1_ref, w2_ref, b2_ref,
                     ed_ref, wd1_ref, bd1_ref, wout_ref, bout_ref,
                     gen_ref, dfake_ref):
    """Fused generator + discriminator on the generated batch only (no real x)."""
    tm = z_ref.shape[0]
    oh_g = _one_hot_bf16(gy_ref[...], k)
    gen = _gen_compute(z_ref[...], oh_g, w1z_ref[...], w1e_ref[...], b1_ref[...],
                       w2_ref[...], b2_ref[...])
    gen_ref[...] = gen                                        # exported for only_gz
    lf = _disc_logits(gen, oh_g, ed_ref[...], wd1_ref[...], bd1_ref[...],
                      wout_ref[...], bout_ref[...], policy)
    dfake_ref[...] = jnp.broadcast_to(lf, (tm, LANE))


def _disc_only_kernel(policy, k, x_ref, y_ref,
                      ed_ref, wd1_ref, bd1_ref, wout_ref, bout_ref, out_ref):
    """Standalone discriminator (used for the unequal fake/real batch path)."""
    tm = x_ref.shape[0]
    oh = _one_hot_bf16(y_ref[...], k)
    logit = _disc_logits(x_ref[...], oh, ed_ref[...], wd1_ref[...], bd1_ref[...],
                         wout_ref[...], bout_ref[...], policy)
    out_ref[...] = jnp.broadcast_to(logit, (tm, LANE))


# ----------------------------------- wrappers ----------------------------------------

def _pick_tm(n):
    # For batches >= 16 use two grid steps so dimension_semantics=("parallel",)
    # can shard the batch across the 2 TensorCores on v7x (no-op on v5e/v6e).
    if n >= 16 and (n // 2) % 8 == 0:
        return n // 2
    return n


def _wspec(arr):
    return pl.BlockSpec(arr.shape, lambda m: (0, 0))          # grid-invariant weight


def _vmem_guard(block_arrays, limit_bytes=28 << 20):
    # The pipeline double-buffers every block (including grid-invariant weights);
    # guard against the 32 MiB default scoped limit / v7x 64 MiB physical VMEM.
    total = 2 * sum(int(np.prod(s)) * jnp.dtype(d).itemsize for s, d in block_arrays)
    assert total < limit_bytes, (
        f"double-buffered VMEM estimate {total} B exceeds {limit_bytes} B; shrink the "
        "batch tile or set pipeline_mode=pl.Buffered(1) on the invariant weight specs")


def gan_forward_pair(params, z, gy, x, dy, policy=False):
    n, zd = z.shape
    k, _ = params["W1e_eff"].shape
    d_img = params["W2"].shape[1]
    assert n % 8 == 0 and x.shape[0] == n
    tm = _pick_tm(n)
    gy2 = gy.reshape(n, 1).astype(jnp.int32)
    dy2 = dy.reshape(n, 1).astype(jnp.int32)
    x_flat = x.reshape(n, d_img)

    weight_names = _GEN_WEIGHTS + _DISC_WEIGHTS
    _vmem_guard([((tm, zd), jnp.float32), ((tm, 1), jnp.int32),
                 ((tm, d_img), jnp.float32), ((tm, 1), jnp.int32),
                 ((tm, LANE), jnp.float32), ((tm, LANE), jnp.float32)]
                + [(params[w].shape, params[w].dtype) for w in weight_names])

    kern = functools.partial(_gan_pair_kernel, bool(policy), k)
    d_fake, d_real = pl.pallas_call(
        kern,
        out_shape=(jax.ShapeDtypeStruct((n, LANE), jnp.float32),
                   jax.ShapeDtypeStruct((n, LANE), jnp.float32)),
        grid=(n // tm,),
        in_specs=[
            pl.BlockSpec((tm, zd), lambda m: (m, 0)),
            pl.BlockSpec((tm, 1), lambda m: (m, 0)),
            pl.BlockSpec((tm, d_img), lambda m: (m, 0)),
            pl.BlockSpec((tm, 1), lambda m: (m, 0)),
        ] + [_wspec(params[w]) for w in weight_names],
        out_specs=(pl.BlockSpec((tm, LANE), lambda m: (m, 0)),
                   pl.BlockSpec((tm, LANE), lambda m: (m, 0))),
        compiler_params=pltpu.CompilerParams(dimension_semantics=("parallel",)),
    )(z, gy2, x_flat, dy2, *[params[w] for w in weight_names])
    return d_fake[:, 0], d_real[:, 0]


def gan_forward_fake(params, z, gy, policy=False):
    n, zd = z.shape
    k, _ = params["W1e_eff"].shape
    d_img = params["W2"].shape[1]
    assert n % 8 == 0
    tm = _pick_tm(n)
    gy2 = gy.reshape(n, 1).astype(jnp.int32)

    weight_names = _GEN_WEIGHTS + _DISC_WEIGHTS
    _vmem_guard([((tm, zd), jnp.float32), ((tm, 1), jnp.int32),
                 ((tm, d_img), jnp.float32), ((tm, LANE), jnp.float32)]
                + [(params[w].shape, params[w].dtype) for w in weight_names])

    kern = functools.partial(_gan_fake_kernel, bool(policy), k)
    gen_flat, d_fake = pl.pallas_call(
        kern,
        out_shape=(jax.ShapeDtypeStruct((n, d_img), jnp.float32),
                   jax.ShapeDtypeStruct((n, LANE), jnp.float32)),
        grid=(n // tm,),
        in_specs=[
            pl.BlockSpec((tm, zd), lambda m: (m, 0)),
            pl.BlockSpec((tm, 1), lambda m: (m, 0)),
        ] + [_wspec(params[w]) for w in weight_names],
        out_specs=(pl.BlockSpec((tm, d_img), lambda m: (m, 0)),
                   pl.BlockSpec((tm, LANE), lambda m: (m, 0))),
        compiler_params=pltpu.CompilerParams(dimension_semantics=("parallel",)),
    )(z, gy2, *[params[w] for w in weight_names])
    c, h_, w_ = params["img_shape"]
    return d_fake[:, 0], gen_flat.reshape(n, c, h_, w_)


def discriminator_forward(params, img, y, policy=False):
    n = img.shape[0]
    k = params["Ed"].shape[0]
    d_img = params["Wd1"].shape[0]
    assert n % 8 == 0
    tm = _pick_tm(n)
    flat = img.reshape(n, d_img)
    y2 = y.reshape(n, 1).astype(jnp.int32)

    _vmem_guard([((tm, d_img), jnp.float32), ((tm, 1), jnp.int32),
                 ((tm, LANE), jnp.float32)]
                + [(params[w].shape, params[w].dtype) for w in _DISC_WEIGHTS])

    kern = functools.partial(_disc_only_kernel, bool(policy), k)
    out = pl.pallas_call(
        kern,
        out_shape=jax.ShapeDtypeStruct((n, LANE), jnp.float32),
        grid=(n // tm,),
        in_specs=[
            pl.BlockSpec((tm, d_img), lambda m: (m, 0)),
            pl.BlockSpec((tm, 1), lambda m: (m, 0)),
        ] + [_wspec(params[w]) for w in _DISC_WEIGHTS],
        out_specs=pl.BlockSpec((tm, LANE), lambda m: (m, 0)),
        compiler_params=pltpu.CompilerParams(dimension_semantics=("parallel",)),
    )(flat, y2, *[params[w] for w in _DISC_WEIGHTS])
    return out[:, 0]


# ------------------------------ GAN composition (torch forward) ------------------------------

def gan_forward(params, z, gy, x=None, dy=None, train_generator=False,
                only_gz=False, policy=False):
    # `train_generator` only toggles autograd in torch; forward math is identical.
    del train_generator
    if x is not None:
        assert dy is not None
        if x.shape[0] == z.shape[0]:
            return gan_forward_pair(params, z, gy, x, dy, policy)
        # Unequal fake/real batch: fused fake path + standalone disc for real.
        d_fake, _ = gan_forward_fake(params, z, gy, policy)
        d_real = discriminator_forward(params, x, dy, policy)
        return d_fake, d_real
    d_fake, generated = gan_forward_fake(params, z, gy, policy)
    if only_gz:
        return d_fake, generated
    return d_fake


# ------------------------------------ parameters ------------------------------------

def init_params(key, *, z_dim=32, emb_dim=32, hidden_g=256, hidden_d=256,
                num_classes=10, channels=4, height=16, width=16):
    d_img = channels * height * width
    ks = jax.random.split(key, 10)
    bf16 = jnp.bfloat16

    def nrm(k, shape, scale):
        return scale * jax.random.normal(k, shape, dtype=jnp.float32)

    eg = nrm(ks[0], (num_classes, emb_dim), 1.0)
    w1e = nrm(ks[2], (emb_dim, hidden_g), 1.0 / np.sqrt(emb_dim))
    # Class embedding folded algebraically into layer 1: onehot @ (Eg @ W1e).
    w1e_eff = jnp.dot(eg, w1e)
    return dict(
        img_shape=(channels, height, width),
        # bf16 weight storage (halves weight DMA); f32 biases (elementwise stays f32).
        W1z=nrm(ks[1], (z_dim, hidden_g), 1.0 / np.sqrt(z_dim)).astype(bf16),
        W1e_eff=w1e_eff.astype(bf16),
        b1=nrm(ks[7], (1, hidden_g), 0.02),
        W2=nrm(ks[3], (hidden_g, d_img), 1.0 / np.sqrt(hidden_g)).astype(bf16),
        b2=nrm(ks[8], (1, d_img), 0.02),
        Ed=nrm(ks[4], (num_classes, hidden_d), 1.0 / np.sqrt(hidden_d)).astype(bf16),
        Wd1=nrm(ks[5], (d_img, hidden_d), 1.0 / np.sqrt(d_img)).astype(bf16),
        bd1=nrm(ks[9], (1, hidden_d), 0.02),
        Wout=nrm(ks[6], (1, hidden_d), 1.0 / np.sqrt(hidden_d)).astype(bf16),
        bout=jnp.full((1, 1), 0.05, jnp.float32),
    )


# ------------------------------ pure-JAX reference (check) ------------------------------

def _ref_generator(params, z, gy):
    f32 = jnp.float32
    k = params["W1e_eff"].shape[0]
    oh = jax.nn.one_hot(gy, k, dtype=jnp.bfloat16)
    h = jnp.dot(z.astype(jnp.bfloat16), params["W1z"], preferred_element_type=f32)
    h = h + jnp.dot(oh, params["W1e_eff"], preferred_element_type=f32)
    h = jnp.maximum(h + params["b1"], 0.0)
    img = jnp.dot(h.astype(jnp.bfloat16), params["W2"], preferred_element_type=f32)
    img = jnp.tanh(img + params["b2"])
    return img.reshape((z.shape[0],) + params["img_shape"])


def _ref_discriminator(params, img, y, policy=False):
    f32 = jnp.float32
    n = img.shape[0]
    x = img.reshape(n, -1)
    if policy:
        x = x + 0.1
        mean = jnp.mean(x, axis=-1, keepdims=True)
        x = (x - mean) * 1.2 + mean
    k = params["Ed"].shape[0]
    oh = jax.nn.one_hot(y, k, dtype=jnp.bfloat16)
    h = jnp.dot(x.astype(jnp.bfloat16), params["Wd1"], preferred_element_type=f32)
    h = h + params["bd1"]
    h = jnp.where(h > 0.0, h, 0.2 * h)
    emb = jnp.dot(oh, params["Ed"], preferred_element_type=f32)
    proj = jnp.sum(h * emb, axis=-1)
    logit = jnp.sum(h * params["Wout"].astype(f32), axis=-1)
    return logit + proj + params["bout"][0, 0]


def _ref_gan_forward(params, z, gy, x=None, dy=None, only_gz=False, policy=False):
    generated = _ref_generator(params, z, gy)
    if x is not None:
        d_in = jnp.concatenate([generated, x], axis=0)
        d_y = jnp.concatenate([gy, dy], axis=0)
        d_out = _ref_discriminator(params, d_in, d_y, policy)
        return d_out[:generated.shape[0]], d_out[generated.shape[0]:]
    d_out = _ref_discriminator(params, generated, gy, policy)
    if only_gz:
        return d_out, generated
    return d_out


# --------------------------------------- main ---------------------------------------

if __name__ == "__main__":
    key = jax.random.PRNGKey(0)
    pk, zk, gyk, xk, dyk, xk2, dyk2 = jax.random.split(key, 7)

    N = 8
    NUM_CLASSES = 10
    C, H, W = 4, 16, 16
    Z_DIM = 32

    params = init_params(pk, z_dim=Z_DIM, channels=C, height=H, width=W,
                         num_classes=NUM_CLASSES)
    z = jax.random.normal(zk, (N, Z_DIM), dtype=jnp.float32)
    gy = jax.random.randint(gyk, (N,), 0, NUM_CLASSES)
    x = jnp.tanh(jax.random.normal(xk, (N, C, H, W), dtype=jnp.float32))
    dy = jax.random.randint(dyk, (N,), 0, NUM_CLASSES)

    # Path 1: fake + real (equal batch) -> split logits, fully fused pair kernel.
    d_fake, d_real = gan_forward(params, z, gy, x=x, dy=dy, policy=False)
    jax.block_until_ready((d_fake, d_real))

    # Path 2: only_gz -> (logits, generated image) from the fused fake kernel.
    d_only, gz = gan_forward(params, z, gy, only_gz=True)
    jax.block_until_ready((d_only, gz))

    # Path 3: unequal fake/real batch -> fused fake kernel + standalone disc kernel.
    x2 = jnp.tanh(jax.random.normal(xk2, (2 * N, C, H, W), dtype=jnp.float32))
    dy2 = jax.random.randint(dyk2, (2 * N,), 0, NUM_CLASSES)
    d_fake_u, d_real_u = gan_forward(params, z, gy, x=x2, dy=dy2)
    jax.block_until_ready((d_fake_u, d_real_u))

    # Correctness vs a pure-JAX reference with the same bf16-weight / f32-acc numerics.
    rf, rr = _ref_gan_forward(params, z, gy, x=x, dy=dy)
    ro, rg = _ref_gan_forward(params, z, gy, only_gz=True)
    rfu, rru = _ref_gan_forward(params, z, gy, x=x2, dy=dy2)
    np.testing.assert_allclose(np.asarray(d_fake), np.asarray(rf), rtol=5e-2, atol=5e-2)
    np.testing.assert_allclose(np.asarray(d_real), np.asarray(rr), rtol=5e-2, atol=5e-2)
    np.testing.assert_allclose(np.asarray(d_only), np.asarray(ro), rtol=5e-2, atol=5e-2)
    np.testing.assert_allclose(np.asarray(gz), np.asarray(rg), rtol=5e-2, atol=5e-2)
    np.testing.assert_allclose(np.asarray(d_fake_u), np.asarray(rfu), rtol=5e-2, atol=5e-2)
    np.testing.assert_allclose(np.asarray(d_real_u), np.asarray(rru), rtol=5e-2, atol=5e-2)

    print("KERNEL_OK")
</pallas_src>

<mosaic_0001>
module attributes {stable_mosaic.version = 11 : i64} {
  func.func @_gan_pair_kernel(%arg0: i32, %arg1: memref<8x32xf32, #tpu.memory_space<vmem>>, %arg2: memref<8x1xi32, #tpu.memory_space<vmem>>, %arg3: memref<8x1024xf32, #tpu.memory_space<vmem>>, %arg4: memref<8x1xi32, #tpu.memory_space<vmem>>, %arg5: memref<32x256xbf16, #tpu.memory_space<vmem>>, %arg6: memref<10x256xbf16, #tpu.memory_space<vmem>>, %arg7: memref<1x256xf32, #tpu.memory_space<vmem>>, %arg8: memref<256x1024xbf16, #tpu.memory_space<vmem>>, %arg9: memref<1x1024xf32, #tpu.memory_space<vmem>>, %arg10: memref<10x256xbf16, #tpu.memory_space<vmem>>, %arg11: memref<1024x256xbf16, #tpu.memory_space<vmem>>, %arg12: memref<1x256xf32, #tpu.memory_space<vmem>>, %arg13: memref<1x256xbf16, #tpu.memory_space<vmem>>, %arg14: memref<1x1xf32, #tpu.memory_space<vmem>>, %arg15: memref<8x128xf32, #tpu.memory_space<vmem>>, %arg16: memref<8x128xf32, #tpu.memory_space<vmem>>) attributes {dimension_semantics = [#tpu.dimension_semantics<parallel>], iteration_bounds = array<i64: 1>, scalar_prefetch = 0 : i64, scratch_operands = 0 : i64, tpu.core_type = #tpu.core_type<tc>, window_params = [{transform_indices = @transform_0, window_bounds = array<i64: 8, 32>}, {transform_indices = @transform_1, window_bounds = array<i64: 8, 1>}, {transform_indices = @transform_2, window_bounds = array<i64: 8, 1024>}, {transform_indices = @transform_3, window_bounds = array<i64: 8, 1>}, {pipeline_mode = #tpu.pipeline_mode<synchronous>, transform_indices = @transform_4, window_bounds = array<i64: 32, 256>}, {pipeline_mode = #tpu.pipeline_mode<synchronous>, transform_indices = @transform_5, window_bounds = array<i64: 10, 256>}, {pipeline_mode = #tpu.pipeline_mode<synchronous>, transform_indices = @transform_6, window_bounds = array<i64: 1, 256>}, {pipeline_mode = #tpu.pipeline_mode<synchronous>, transform_indices = @transform_7, window_bounds = array<i64: 256, 1024>}, {pipeline_mode = #tpu.pipeline_mode<synchronous>, transform_indices = @transform_8, window_bounds = array<i64: 1, 1024>}, {pipeline_mode = #tpu.pipeline_mode<synchronous>, transform_indices = @transform_9, window_bounds = array<i64: 10, 256>}, {pipeline_mode = #tpu.pipeline_mode<synchronous>, transform_indices = @transform_10, window_bounds = array<i64: 1024, 256>}, {pipeline_mode = #tpu.pipeline_mode<synchronous>, transform_indices = @transform_11, window_bounds = array<i64: 1, 256>}, {pipeline_mode = #tpu.pipeline_mode<synchronous>, transform_indices = @transform_12, window_bounds = array<i64: 1, 256>}, {pipeline_mode = #tpu.pipeline_mode<synchronous>, transform_indices = @transform_13, window_bounds = array<i64: 1, 1>}, {transform_indices = @transform_14, window_bounds = array<i64: 8, 128>}, {transform_indices = @transform_15, window_bounds = array<i64: 8, 128>}]} {
    %c0 = arith.constant 0 : index
    %c0_0 = arith.constant 0 : index
    %0 = vector.load %arg2[%c0, %c0_0] : memref<8x1xi32, #tpu.memory_space<vmem>>, vector<8x1xi32>
    %1 = tpu.iota {dimensions = array<i32: 1>} : vector<8x10xi32>
    %2 = vector.broadcast %0 : vector<8x1xi32> to vector<8x10xi32>
    %3 = arith.cmpi eq, %2, %1 : vector<8x10xi32>
    %4 = arith.extui %3 : vector<8x10xi1> to vector<8x10xi32>
    %5 = arith.sitofp %4 : vector<8x10xi32> to vector<8x10xf32>
    %6 = arith.truncf %5 : vector<8x10xf32> to vector<8x10xbf16>
    %c0_1 = arith.constant 0 : index
    %c0_2 = arith.constant 0 : index
    %7 = vector.load %arg4[%c0_1, %c0_2] : memref<8x1xi32, #tpu.memory_space<vmem>>, vector<8x1xi32>
    %8 = tpu.iota {dimensions = array<i32: 1>} : vector<8x10xi32>
    %9 = vector.broadcast %7 : vector<8x1xi32> to vector<8x10xi32>
    %10 = arith.cmpi eq, %9, %8 : vector<8x10xi32>
    %11 = arith.extui %10 : vector<8x10xi1> to vector<8x10xi32>
    %12 = arith.sitofp %11 : vector<8x10xi32> to vector<8x10xf32>
    %13 = arith.truncf %12 : vector<8x10xf32> to vector<8x10xbf16>
    %c0_3 = arith.constant 0 : index
    %c0_4 = arith.constant 0 : index
    %14 = vector.load %arg1[%c0_3, %c0_4] : memref<8x32xf32, #tpu.memory_space<vmem>>, vector<8x32xf32>
    %c0_5 = arith.constant 0 : index
    %c0_6 = arith.constant 0 : index
    %15 = vector.load %arg5[%c0_5, %c0_6] : memref<32x256xbf16, #tpu.memory_space<vmem>>, vector<32x256xbf16>
    %c0_7 = arith.constant 0 : index
    %c0_8 = arith.constant 0 : index
    %16 = vector.load %arg6[%c0_7, %c0_8] : memref<10x256xbf16, #tpu.memory_space<vmem>>, vector<10x256xbf16>
    %c0_9 = arith.constant 0 : index
    %c0_10 = arith.constant 0 : index
    %17 = vector.load %arg7[%c0_9, %c0_10] : memref<1x256xf32, #tpu.memory_space<vmem>>, vector<1x256xf32>
    %c0_11 = arith.constant 0 : index
    %c0_12 = arith.constant 0 : index
    %18 = vector.load %arg8[%c0_11, %c0_12] : memref<256x1024xbf16, #tpu.memory_space<vmem>>, vector<256x1024xbf16>
    %c0_13 = arith.constant 0 : index
    %c0_14 = arith.constant 0 : index
    %19 = vector.load %arg9[%c0_13, %c0_14] : memref<1x1024xf32, #tpu.memory_space<vmem>>, vector<1x1024xf32>
    %20 = arith.truncf %14 : vector<8x32xf32> to vector<8x32xbf16>
    %cst = arith.constant dense<0.000000e+00> : vector<8x256xf32>
    %21 = tpu.matmul %20, %15, %cst {dimension_numbers = #tpu.dot_dimension_numbers<[1], [0], [0], [1], [0, 0, 1, 1], [], []>} : vector<8x32xbf16>, vector<32x256xbf16>, vector<8x256xf32> -> vector<8x256xf32>
    %cst_15 = arith.constant dense<0.000000e+00> : vector<8x256xf32>
    %22 = tpu.matmul %6, %16, %cst_15 {dimension_numbers = #tpu.dot_dimension_numbers<[1], [0], [0], [1], [0, 0, 1, 1], [], []>} : vector<8x10xbf16>, vector<10x256xbf16>, vector<8x256xf32> -> vector<8x256xf32>
    %23 = arith.addf %21, %22 : vector<8x256xf32>
    %24 = vector.broadcast %17 : vector<1x256xf32> to vector<8x256xf32>
    %25 = arith.addf %23, %24 : vector<8x256xf32>
    %cst_16 = arith.constant 0.000000e+00 : f32
    %26 = vector.broadcast %cst_16 : f32 to vector<8x256xf32>
    %27 = arith.maximumf %25, %26 : vector<8x256xf32>
    %28 = arith.truncf %27 : vector<8x256xf32> to vector<8x256xbf16>
    %cst_17 = arith.constant dense<0.000000e+00> : vector<8x1024xf32>
    %29 = tpu.matmul %28, %18, %cst_17 {dimension_numbers = #tpu.dot_dimension_numbers<[1], [0], [0], [1], [0, 0, 1, 1], [], []>} : vector<8x256xbf16>, vector<256x1024xbf16>, vector<8x1024xf32> -> vector<8x1024xf32>
    %30 = vector.broadcast %19 : vector<1x1024xf32> to vector<8x1024xf32>
    %31 = arith.addf %29, %30 : vector<8x1024xf32>
    %32 = math.tanh %31 : vector<8x1024xf32>
    %c0_18 = arith.constant 0 : index
    %c0_19 = arith.constant 0 : index
    %33 = vector.load %arg10[%c0_18, %c0_19] : memref<10x256xbf16, #tpu.memory_space<vmem>>, vector<10x256xbf16>
    %c0_20 = arith.constant 0 : index
    %c0_21 = arith.constant 0 : index
    %34 = vector.load %arg11[%c0_20, %c0_21] : memref<1024x256xbf16, #tpu.memory_space<vmem>>, vector<1024x256xbf16>
    %c0_22 = arith.constant 0 : index
    %c0_23 = arith.constant 0 : index
    %35 = vector.load %arg12[%c0_22, %c0_23] : memref<1x256xf32, #tpu.memory_space<vmem>>, vector<1x256xf32>
    %c0_24 = arith.constant 0 : index
    %c0_25 = arith.constant 0 : index
    %36 = vector.load %arg13[%c0_24, %c0_25] : memref<1x256xbf16, #tpu.memory_space<vmem>>, vector<1x256xbf16>
    %c0_26 = arith.constant 0 : index
    %c0_27 = arith.constant 0 : index
    %37 = vector.load %arg14[%c0_26, %c0_27] : memref<1x1xf32, #tpu.memory_space<vmem>>, vector<1x1xf32>
    %38 = arith.truncf %32 : vector<8x1024xf32> to vector<8x1024xbf16>
    %cst_28 = arith.constant dense<0.000000e+00> : vector<8x256xf32>
    %39 = tpu.matmul %38, %34, %cst_28 {dimension_numbers = #tpu.dot_dimension_numbers<[1], [0], [0], [1], [0, 0, 1, 1], [], []>} : vector<8x1024xbf16>, vector<1024x256xbf16>, vector<8x256xf32> -> vector<8x256xf32>
    %40 = vector.broadcast %35 : vector<1x256xf32> to vector<8x256xf32>
    %41 = arith.addf %39, %40 : vector<8x256xf32>
    %cst_29 = arith.constant 0.000000e+00 : f32
    %42 = vector.broadcast %cst_29 : f32 to vector<8x256xf32>
    %43 = arith.cmpf ogt, %41, %42 : vector<8x256xf32>
    %cst_30 = arith.constant 2.000000e-01 : f32
    %44 = vector.broadcast %cst_30 : f32 to vector<8x256xf32>
    %45 = arith.mulf %44, %41 : vector<8x256xf32>
    %46 = arith.select %43, %41, %45 : vector<8x256xi1>, vector<8x256xf32>
    %cst_31 = arith.constant dense<0.000000e+00> : vector<8x256xf32>
    %47 = tpu.matmul %6, %33, %cst_31 {dimension_numbers = #tpu.dot_dimension_numbers<[1], [0], [0], [1], [0, 0, 1, 1], [], []>} : vector<8x10xbf16>, vector<10x256xbf16>, vector<8x256xf32> -> vector<8x256xf32>
    %48 = arith.mulf %46, %47 : vector<8x256xf32>
    %cst_32 = arith.constant dense<0.000000e+00> : vector<8xf32>
    %49 = vector.multi_reduction <add>, %48, %cst_32 [1] : vector<8x256xf32> to vector<8xf32>
    %50 = vector.shape_cast %49 : vector<8xf32> to vector<8x1xf32>
    %51 = arith.extf %36 : vector<1x256xbf16> to vector<1x256xf32>
    %52 = vector.broadcast %51 : vector<1x256xf32> to vector<8x256xf32>
    %53 = arith.mulf %46, %52 : vector<8x256xf32>
    %cst_33 = arith.constant dense<0.000000e+00> : vector<8xf32>
    %54 = vector.multi_reduction <add>, %53, %cst_33 [1] : vector<8x256xf32> to vector<8xf32>
    %55 = vector.shape_cast %54 : vector<8xf32> to vector<8x1xf32>
    %56 = arith.addf %55, %50 : vector<8x1xf32>
    %57 = vector.broadcast %37 : vector<1x1xf32> to vector<8x1xf32>
    %58 = arith.addf %56, %57 : vector<8x1xf32>
    %c0_34 = arith.constant 0 : index
    %c0_35 = arith.constant 0 : index
    %59 = vector.load %arg3[%c0_34, %c0_35] : memref<8x1024xf32, #tpu.memory_space<vmem>>, vector<8x1024xf32>
    %c0_36 = arith.constant 0 : index
    %c0_37 = arith.constant 0 : index
    %60 = vector.load %arg10[%c0_36, %c0_37] : memref<10x256xbf16, #tpu.memory_space<vmem>>, vector<10x256xbf16>
    %c0_38 = arith.constant 0 : index
    %c0_39 = arith.constant 0 : index
    %61 = vector.load %arg11[%c0_38, %c0_39] : memref<1024x256xbf16, #tpu.memory_space<vmem>>, vector<1024x256xbf16>
    %c0_40 = arith.constant 0 : index
    %c0_41 = arith.constant 0 : index
    %62 = vector.load %arg12[%c0_40, %c0_41] : memref<1x256xf32, #tpu.memory_space<vmem>>, vector<1x256xf32>
    %c0_42 = arith.constant 0 : index
    %c0_43 = arith.constant 0 : index
    %63 = vector.load %arg13[%c0_42, %c0_43] : memref<1x256xbf16, #tpu.memory_space<vmem>>, vector<1x256xbf16>
    %c0_44 = arith.constant 0 : index
    %c0_45 = arith.constant 0 : index
    %64 = vector.load %arg14[%c0_44, %c0_45] : memref<1x1xf32, #tpu.memory_space<vmem>>, vector<1x1xf32>
    %65 = arith.truncf %59 : vector<8x1024xf32> to vector<8x1024xbf16>
    %cst_46 = arith.constant dense<0.000000e+00> : vector<8x256xf32>
    %66 = tpu.matmul %65, %61, %cst_46 {dimension_numbers = #tpu.dot_dimension_numbers<[1], [0], [0], [1], [0, 0, 1, 1], [], []>} : vector<8x1024xbf16>, vector<1024x256xbf16>, vector<8x256xf32> -> vector<8x256xf32>
    %67 = vector.broadcast %62 : vector<1x256xf32> to vector<8x256xf32>
    %68 = arith.addf %66, %67 : vector<8x256xf32>
    %cst_47 = arith.constant 0.000000e+00 : f32
    %69 = vector.broadcast %cst_47 : f32 to vector<8x256xf32>
    %70 = arith.cmpf ogt, %68, %69 : vector<8x256xf32>
    %cst_48 = arith.constant 2.000000e-01 : f32
    %71 = vector.broadcast %cst_48 : f32 to vector<8x256xf32>
    %72 = arith.mulf %71, %68 : vector<8x256xf32>
    %73 = arith.select %70, %68, %72 : vector<8x256xi1>, vector<8x256xf32>
    %cst_49 = arith.constant dense<0.000000e+00> : vector<8x256xf32>
    %74 = tpu.matmul %13, %60, %cst_49 {dimension_numbers = #tpu.dot_dimension_numbers<[1], [0], [0], [1], [0, 0, 1, 1], [], []>} : vector<8x10xbf16>, vector<10x256xbf16>, vector<8x256xf32> -> vector<8x256xf32>
    %75 = arith.mulf %73, %74 : vector<8x256xf32>
    %cst_50 = arith.constant dense<0.000000e+00> : vector<8xf32>
    %76 = vector.multi_reduction <add>, %75, %cst_50 [1] : vector<8x256xf32> to vector<8xf32>
    %77 = vector.shape_cast %76 : vector<8xf32> to vector<8x1xf32>
    %78 = arith.extf %63 : vector<1x256xbf16> to vector<1x256xf32>
    %79 = vector.broadcast %78 : vector<1x256xf32> to vector<8x256xf32>
    %80 = arith.mulf %73, %79 : vector<8x256xf32>
    %cst_51 = arith.constant dense<0.000000e+00> : vector<8xf32>
    %81 = vector.multi_reduction <add>, %80, %cst_51 [1] : vector<8x256xf32> to vector<8xf32>
    %82 = vector.shape_cast %81 : vector<8xf32> to vector<8x1xf32>
    %83 = arith.addf %82, %77 : vector<8x1xf32>
    %84 = vector.broadcast %64 : vector<1x1xf32> to vector<8x1xf32>
    %85 = arith.addf %83, %84 : vector<8x1xf32>
    %86 = vector.shape_cast %58 : vector<8x1xf32> to vector<8x1xf32>
    %87 = vector.broadcast %86 : vector<8x1xf32> to vector<8x128xf32>
    %c0_52 = arith.constant 0 : index
    %c0_53 = arith.constant 0 : index
    %88 = vector.load %arg15[%c0_52, %c0_53] : memref<8x128xf32, #tpu.memory_space<vmem>>, vector<8x128xf32>
    tpu.vector_store %arg15[%c0_52, %c0_53], %87 {strides = array<i32>} : memref<8x128xf32, #tpu.memory_space<vmem>>, vector<8x128xf32>,
    %89 = vector.shape_cast %85 : vector<8x1xf32> to vector<8x1xf32>
    %90 = vector.broadcast %89 : vector<8x1xf32> to vector<8x128xf32>
    %c0_54 = arith.constant 0 : index
    %c0_55 = arith.constant 0 : index
    %91 = vector.load %arg16[%c0_54, %c0_55] : memref<8x128xf32, #tpu.memory_space<vmem>>, vector<8x128xf32>
    tpu.vector_store %arg16[%c0_54, %c0_55], %90 {strides = array<i32>} : memref<8x128xf32, #tpu.memory_space<vmem>>, vector<8x128xf32>,
    return
  }
  func.func @transform_0(%arg0: i32) -> (i32, i32) {
    %c0_i32 = arith.constant 0 : i32
    %c0_i32_0 = arith.constant 0 : i32
    return %arg0, %c0_i32 : i32, i32
  }
  func.func @transform_1(%arg0: i32) -> (i32, i32) {
    %c0_i32 = arith.constant 0 : i32
    %c0_i32_0 = arith.constant 0 : i32
    return %arg0, %c0_i32 : i32, i32
  }
  func.func @transform_2(%arg0: i32) -> (i32, i32) {
    %c0_i32 = arith.constant 0 : i32
    %c0_i32_0 = arith.constant 0 : i32
    return %arg0, %c0_i32 : i32, i32
  }
  func.func @transform_3(%arg0: i32) -> (i32, i32) {
    %c0_i32 = arith.constant 0 : i32
    %c0_i32_0 = arith.constant 0 : i32
    return %arg0, %c0_i32 : i32, i32
  }
  func.func @transform_4(%arg0: i32) -> (i32, i32) {
    %c0_i32 = arith.constant 0 : i32
    %c0_i32_0 = arith.constant 0 : i32
    %c0_i32_1 = arith.constant 0 : i32
    return %c0_i32, %c0_i32_0 : i32, i32
  }
  func.func @transform_5(%arg0: i32) -> (i32, i32) {
    %c0_i32 = arith.constant 0 : i32
    %c0_i32_0 = arith.constant 0 : i32
    %c0_i32_1 = arith.constant 0 : i32
    return %c0_i32, %c0_i32_0 : i32, i32
  }
  func.func @transform_6(%arg0: i32) -> (i32, i32) {
    %c0_i32 = arith.constant 0 : i32
    %c0_i32_0 = arith.constant 0 : i32
    %c0_i32_1 = arith.constant 0 : i32
    return %c0_i32, %c0_i32_0 : i32, i32
  }
  func.func @transform_7(%arg0: i32) -> (i32, i32) {
    %c0_i32 = arith.constant 0 : i32
    %c0_i32_0 = arith.constant 0 : i32
    %c0_i32_1 = arith.constant 0 : i32
    return %c0_i32, %c0_i32_0 : i32, i32
  }
  func.func @transform_8(%arg0: i32) -> (i32, i32) {
    %c0_i32 = arith.constant 0 : i32
    %c0_i32_0 = arith.constant 0 : i32
    %c0_i32_1 = arith.constant 0 : i32
    return %c0_i32, %c0_i32_0 : i32, i32
  }
  func.func @transform_9(%arg0: i32) -> (i32, i32) {
    %c0_i32 = arith.constant 0 : i32
    %c0_i32_0 = arith.constant 0 : i32
    %c0_i32_1 = arith.constant 0 : i32
    return %c0_i32, %c0_i32_0 : i32, i32
  }
  func.func @transform_10(%arg0: i32) -> (i32, i32) {
    %c0_i32 = arith.constant 0 : i32
    %c0_i32_0 = arith.constant 0 : i32
    %c0_i32_1 = arith.constant 0 : i32
    return %c0_i32, %c0_i32_0 : i32, i32
  }
  func.func @transform_11(%arg0: i32) -> (i32, i32) {
    %c0_i32 = arith.constant 0 : i32
    %c0_i32_0 = arith.constant 0 : i32
    %c0_i32_1 = arith.constant 0 : i32
    return %c0_i32, %c0_i32_0 : i32, i32
  }
  func.func @transform_12(%arg0: i32) -> (i32, i32) {
    %c0_i32 = arith.constant 0 : i32
    %c0_i32_0 = arith.constant 0 : i32
    %c0_i32_1 = arith.constant 0 : i32
    return %c0_i32, %c0_i32_0 : i32, i32
  }
  func.func @transform_13(%arg0: i32) -> (i32, i32) {
    %c0_i32 = arith.constant 0 : i32
    %c0_i32_0 = arith.constant 0 : i32
    %c0_i32_1 = arith.constant 0 : i32
    return %c0_i32, %c0_i32_0 : i32, i32
  }
  func.func @transform_14(%arg0: i32) -> (i32, i32) {
    %c0_i32 = arith.constant 0 : i32
    %c0_i32_0 = arith.constant 0 : i32
    return %arg0, %c0_i32 : i32, i32
  }
  func.func @transform_15(%arg0: i32) -> (i32, i32) {
    %c0_i32 = arith.constant 0 : i32
    %c0_i32_0 = arith.constant 0 : i32
    return %arg0, %c0_i32 : i32, i32
  }
}

</mosaic_0001>

<bundles_post_ra>
// kernel: tpu_custom_call.1
= control target key start
LH: loop header
LB: loop body
LE: loop exit
PB: predicated region body
PF: predicated region fallthrough
CT: control target
= control target key end

     0   :  { %s4108_s0 = inlined_call_operand.hbm [shape: f32[8,32], index: 0, kind: input, shape index: {}]   ;;  %s4109_s1 = inlined_call_operand.vmem [shape: s32[8,1], index: 1, kind: input, shape index: {}]   ;;  %s4110_s2 = inlined_call_operand.hbm [shape: f32[8,1024], index: 2, kind: input, shape index: {}]   ;;  %s4111_s3 = inlined_call_operand.vmem [shape: s32[8,1], index: 3, kind: input, shape index: {}]   ;;  %s4112_s4 = inlined_call_operand.vmem [shape: bf16[32,256], index: 4, kind: input, shape index: {}]   ;;  %s4113_s5 = inlined_call_operand.hbm [shape: bf16[10,256], index: 5, kind: input, shape index: {}]   ;;  %s4114_s6 = inlined_call_operand.hbm [shape: f32[1,256], index: 6, kind: input, shape index: {}]   ;;  %s4115_s7 = inlined_call_operand.hbm [shape: bf16[256,1024], index: 7, kind: input, shape index: {}]   ;;  %s4116_s8 = inlined_call_operand.hbm [shape: f32[1,1024], index: 8, kind: input, shape index: {}]   ;;  %s4117_s9 = inlined_call_operand.vmem [shape: bf16[10,256], index: 9, kind: input, shape index: {}]   ;;  %s4118_s10 = inlined_call_operand.hbm [shape: bf16[1024,256], index: 10, kind: input, shape index: {}]   ;;  %s4119_s11 = inlined_call_operand.vmem [shape: f32[1,256], index: 11, kind: input, shape index: {}]   ;;  %s4120_s12 = inlined_call_operand.vmem [shape: bf16[1,256], index: 12, kind: input, shape index: {}]   ;;  %s4121_s13 = inlined_call_operand.<no memory space> [shape: f32[1,1], index: 13, kind: input, shape index: {}]   ;;  %s4122_s14 = inlined_call_operand.hbm [shape: f32[8,128], index: 14, kind: output, shape index: {0}]   ;;  %s4123_s15 = inlined_call_operand.hbm [shape: f32[8,128], index: 15, kind: output, shape index: {1}]  }
   0x1   :  { %v21_v0 = vstv %s4121_s13 }
   0x2   :  { %22 = vst [vmem:[#allocation2] sm:$0x1] %v21_v0 }
   0x3   :  { %23 = vsyncpa [#allocation4], 0 }
   0x4   :  { %24 = vsyncpa [#allocation7], 0 }
   0x5   :  { %25 = vsyncpa [#allocation10], 0 }
   0x6   :  { %26 = vsyncpa [#allocation13], 0 }
   0x7   :  { %27 = vsyncpa [#allocation5], 0 }
   0x8   :  { %28 = vsyncpa [#allocation17], 0  ;;  %s3382_s20 = smov [#allocation6]   ;;  %s3383_s22 = smov [#allocation9]  }
   0x9   :  { %s47_s21 = sshll.u32 %s3382_s20, 4  ;;  %s73_s23 = sshll.u32 %s3383_s22, 4  ;;  %s48_s21 = int_to_ptr.vmem [resolvable:$true] %s47_s21  ;;  %s74_s23 = int_to_ptr.vmem [resolvable:$true] %s73_s23 }
   0xa   :  { %s3172_s26 = scalar_lea.hbm %s4110_s2, 1024 }
   0xb   :  { %p3173_p0 = scmp.ne.s32.totalorder %s4110_s2, %s3172_s26  ;;  %p3176_p1 = scmp.lt.u32.totalorder %s3172_s26, %s4110_s2 }
   0xd   :  { %p3178_p2 = pnand %p3176_p1, %p3173_p0 }
   0xf   :  { %3181 = shalt.err (!%p3178_p2)
}
  0x10   :  { %s3182_s30 = scalar_lea.vmem %s48_s21, 1024  ;;  %p3187_p4 = scmp.lt.s32.totalorder %s48_s21, %s48_s21 }
  0x11   :  { %p3183_p3 = scmp.ne.s32.totalorder %s48_s21, %s3182_s30  ;;  %p3188_p5 = scmp.lt.s32.totalorder %s3182_s30, %s3182_s30 }
  0x13   :  { %p3189_p6 = por %p3188_p5, %p3187_p4 }
  0x15   :  { %p3190_p7 = pnand %p3189_p6, %p3183_p3 }
  0x17   :  { %3193 = shalt.err (!%p3190_p7)
}
  0x18   :  { %50 = dma.hbm_to_vmem [thread:$0]  %s4110_s2, 1024, %s48_s21, [#allocation7]  }
  0x19   :  { %s3194_s20 = scalar_lea.hbm %s4114_s6, 32 }
  0x1a   :  { %p3195_p8 = scmp.ne.s32.totalorder %s4114_s6, %s3194_s20  ;;  %p3198_p9 = scmp.lt.u32.totalorder %s3194_s20, %s4114_s6 }
  0x1c   :  { %p3200_p10 = pnand %p3198_p9, %p3195_p8 }
  0x1e   :  { %3203 = shalt.err (!%p3200_p10)
}
  0x1f   :  { %s3204_s27 = scalar_lea.vmem %s74_s23, 32  ;;  %p3209_p12 = scmp.lt.s32.totalorder %s74_s23, %s74_s23 }
  0x20   :  { %p3205_p11 = scmp.ne.s32.totalorder %s74_s23, %s3204_s27  ;;  %p3210_p13 = scmp.lt.s32.totalorder %s3204_s27, %s3204_s27 }
  0x22   :  { %p3211_p0 = por %p3210_p13, %p3209_p12 }
  0x24   :  { %p3212_p1 = pnand %p3211_p0, %p3205_p11 }
  0x26   :  { %3215 = shalt.err (!%p3212_p1)
}
  0x27   :  { %76 = dma.hbm_to_vmem [thread:$0]  %s4114_s6, 32, %s74_s23, [#allocation10]  }
  0x28   :  { %s3384_s28 = smov [#allocation12]   ;;  %s3385_s29 = smov [#allocation3]  }
  0x29   :  { %s95_s13 = sshll.u32 %s3384_s28, 4  ;;  %s35_s30 = sshll.u32 %s3385_s29, 4  ;;  %s96_s13 = int_to_ptr.vmem [resolvable:$true] %s95_s13  ;;  %s36_s30 = int_to_ptr.vmem [resolvable:$true] %s35_s30 }
  0x2a   :  { %s3216_s18 = scalar_lea.hbm %s4116_s8, 128 }
  0x2b   :  { %p3217_p2 = scmp.ne.s32.totalorder %s4116_s8, %s3216_s18  ;;  %p3220_p3 = scmp.lt.u32.totalorder %s3216_s18, %s4116_s8 }
  0x2d   :  { %p3222_p4 = pnand %p3220_p3, %p3217_p2 }
  0x2f   :  { %3225 = shalt.err (!%p3222_p4)
}
  0x30   :  { %s3226_s6 = scalar_lea.vmem %s96_s13, 128  ;;  %p3231_p6 = scmp.lt.s32.totalorder %s96_s13, %s96_s13 }
  0x31   :  { %p3227_p5 = scmp.ne.s32.totalorder %s96_s13, %s3226_s6  ;;  %p3232_p7 = scmp.lt.s32.totalorder %s3226_s6, %s3226_s6 }
  0x33   :  { %p3233_p8 = por %p3232_p7, %p3231_p6 }
  0x35   :  { %p3234_p9 = pnand %p3233_p8, %p3227_p5 }
  0x37   :  { %3237 = shalt.err (!%p3234_p9)
}
  0x38   :  { %98 = dma.hbm_to_vmem [thread:$0]  %s4116_s8, 128, %s96_s13, [#allocation13]  }
  0x39   :  { %s3238_s2 = scalar_lea.hbm %s4108_s0, 128 }
  0x3a   :  { %p3239_p10 = scmp.ne.s32.totalorder %s4108_s0, %s3238_s2  ;;  %p3242_p11 = scmp.lt.u32.totalorder %s3238_s2, %s4108_s0 }
  0x3c   :  { %p3244_p12 = pnand %p3242_p11, %p3239_p10 }
  0x3e   :  { %3247 = shalt.err (!%p3244_p12)
}
  0x3f   :  { %s3248_s17 = scalar_lea.vmem %s36_s30, 128  ;;  %p3253_p0 = scmp.lt.s32.totalorder %s36_s30, %s36_s30 }
  0x40   :  { %p3249_p13 = scmp.ne.s32.totalorder %s36_s30, %s3248_s17  ;;  %p3254_p1 = scmp.lt.s32.totalorder %s3248_s17, %s3248_s17 }
  0x42   :  { %p3255_p2 = por %p3254_p1, %p3253_p0 }
  0x44   :  { %p3256_p3 = pnand %p3255_p2, %p3249_p13 }
  0x46   :  { %3259 = shalt.err (!%p3256_p3)
}
  0x47   :  { %38 = dma.hbm_to_vmem [thread:$0]  %s4108_s0, 128, %s36_s30, [#allocation4]  }
  0x48   :  { %s3386_s18 = smov [#allocation8]   ;;  %s3260_s24 = scalar_lea.hbm %s4113_s5, 256 }
  0x49   :  { %s60_s19 = sshll.u32 %s3386_s18, 4  ;;  %p3261_p4 = scmp.ne.s32.totalorder %s4113_s5, %s3260_s24  ;;  %s61_s19 = int_to_ptr.vmem [resolvable:$true] %s60_s19 }
  0x4a   :  { %p3264_p5 = scmp.lt.u32.totalorder %s3260_s24, %s4113_s5 }
  0x4c   :  { %p3266_p6 = pnand %p3264_p5, %p3261_p4 }
  0x4e   :  { %3269 = shalt.err (!%p3266_p6)
}
  0x4f   :  { %s3270_s27 = scalar_lea.vmem %s61_s19, 256  ;;  %p3275_p8 = scmp.lt.s32.totalorder %s61_s19, %s61_s19 }
  0x50   :  { %p3271_p7 = scmp.ne.s32.totalorder %s61_s19, %s3270_s27  ;;  %p3276_p9 = scmp.lt.s32.totalorder %s3270_s27, %s3270_s27 }
  0x52   :  { %p3277_p10 = por %p3276_p9, %p3275_p8 }
  0x54   :  { %p3278_p11 = pnand %p3277_p10, %p3271_p7 }
  0x56   :  { %3281 = shalt.err (!%p3278_p11)
}
  0x57   :  { %s3387_s0 = smov 128   ;;  %s3388_s30 = smov 8  }
  0x58   :  { %66 = dma.hbm_to_vmem [thread:$0]  %s4113_s5, 256, %s61_s19, [#allocation7], %s3387_s0, %s3387_s0, %s3388_s30  }
  0x59   :  { %s3389_s28 = smov [#allocation11]   ;;  %s3282_s8 = scalar_lea.hbm %s4115_s7, 16384 }
  0x5a   :  { %s82_s29 = sshll.u32 %s3389_s28, 4  ;;  %p3283_p12 = scmp.ne.s32.totalorder %s4115_s7, %s3282_s8  ;;  %s83_s29 = int_to_ptr.vmem [resolvable:$true] %s82_s29 }
  0x5b   :  { %p3286_p13 = scmp.lt.u32.totalorder %s3282_s8, %s4115_s7 }
  0x5d   :  { %p3288_p0 = pnand %p3286_p13, %p3283_p12 }
  0x5f   :  { %3291 = shalt.err (!%p3288_p0)
}
  0x60   :  { %s3292_s24 = scalar_lea.vmem %s83_s29, 16384  ;;  %p3297_p2 = scmp.lt.s32.totalorder %s83_s29, %s83_s29 }
  0x61   :  { %p3293_p1 = scmp.ne.s32.totalorder %s83_s29, %s3292_s24  ;;  %p3298_p3 = scmp.lt.s32.totalorder %s3292_s24, %s3292_s24 }
  0x63   :  { %p3299_p4 = por %p3298_p3, %p3297_p2 }
  0x65   :  { %p3300_p5 = pnand %p3299_p4, %p3293_p1 }
  0x67   :  { %3303 = shalt.err (!%p3300_p5)
}
  0x68   :  { %s3390_s5 = smov 512   ;;  %s3391_s19 = smov 32  }
  0x69   :  { %88 = dma.hbm_to_vmem [thread:$0]  %s4115_s7, 16384, %s83_s29, [#allocation10], %s3390_s5, %s3390_s5, %s3391_s19  }
  0x6a   :  { %s3392_s25 = smov [#allocation14]   ;;  %s3304_s21 = scalar_lea.hbm %s4118_s10, 16384 }
  0x6b   :  { %s106_s26 = sshll.u32 %s3392_s25, 4  ;;  %p3305_p6 = scmp.ne.s32.totalorder %s4118_s10, %s3304_s21  ;;  %s107_s26 = int_to_ptr.vmem [resolvable:$true] %s106_s26 }
  0x6c   :  { %p3308_p7 = scmp.lt.u32.totalorder %s3304_s21, %s4118_s10 }
  0x6e   :  { %p3310_p8 = pnand %p3308_p7, %p3305_p6 }
  0x70   :  { %3313 = shalt.err (!%p3310_p8)
}
  0x71   :  { %s3314_s13 = scalar_lea.vmem %s107_s26, 16384  ;;  %p3319_p10 = scmp.lt.s32.totalorder %s107_s26, %s107_s26 }
  0x72   :  { %p3315_p9 = scmp.ne.s32.totalorder %s107_s26, %s3314_s13  ;;  %p3320_p11 = scmp.lt.s32.totalorder %s3314_s13, %s3314_s13 }
  0x74   :  { %p3321_p12 = por %p3320_p11, %p3319_p10 }
  0x76   :  { %p3322_p13 = pnand %p3321_p12, %p3315_p9 }
  0x78   :  { %3325 = shalt.err (!%p3322_p13)
}
  0x79   :  { %112 = dma.hbm_to_vmem [thread:$0]  %s4118_s10, 16384, %s107_s26, [#allocation13], %s3387_s0, %s3387_s0, %s3388_s30  }
  0x7a   :  { %3370 = dma.done.wait [#allocation4], 128  }
  0x7b   :  { %3371 = vsyncadd [#allocation4], 4294967168 }
  0x7c   :  { %3372 = dma.done.wait [#allocation7], 1280  }
  0x7d   :  { %3373 = vsyncadd [#allocation7], 4294966016 }
  0x7e   :  { %3374 = dma.done.wait [#allocation10], 16416  }
  0x7f   :  { %3375 = vsyncadd [#allocation10], 4294950880 }
  0x80   :  { %3376 = dma.done.wait [#allocation13], 16512  }
  0x81   :  { %3377 = vsyncadd [#allocation13], 4294950784  ;;  %v4124_v1 = vmov 0   ;;  %v141_v2 = vld [vmem:[%s4109_s1] sm:$0xff]  ;;  %v2955_v6 = vld [vmem:[%s4112_s4 + $0x14] ss:$8 sps:$4 sm:$0xff]  }
  0x82   :  { %2950 = vset.pattern.permute.xlu0 %v4124_v1  ;;  %413 = vmatprep.mubr.bf16.mxu1 %v4124_v1  ;;  %v151_v3 = vld [vmem:[%s4111_s3] sm:$0xff]  ;;  %v2957_v7 = vld [vmem:[%s4112_s4 + $0x10] ss:$8 sps:$4 sm:$0xff]   ;;  %vm309_vm0 = vcmask 1044480   ;;  %vm377_vm1 = vcmask 261120   ;;  %vm305_vm3 = vcmask 80896  }
  0x83   :  { %348 = vmatprep.mubr.bf16.mxu0 %v4124_v1  ;;  %2951 = vset.pattern.permute.xlu1 %v4124_v1  ;;  %v2952_v4 = vld [vmem:[%s4112_s4 + $0x4] ss:$8 sps:$4 sm:$0xff]   ;;  %v2954_v5 = vld [vmem:[%s4112_s4] ss:$8 sps:$4 sm:$0xff]   ;;  %s3396_s28 = smov [#allocation16]  }
  0x84   :  { %145 = vperm.xlu0 %2950, %v141_v2   ;;  %381 = vmatprep.subr.bf16.mxu1 %v2952_v4  ;;  %v2958_v8 = vld [vmem:[#allocation8 + $0x4] ss:$8 sps:$4 sm:$0x1f]   ;;  %v2960_v9 = vld [vmem:[#allocation8] ss:$8 sps:$4 sm:$0x1f]  }
  0x85   :  { %382 = vmatpush1.bf16.msra.mxu1 %v2954_v5  ;;  %v159_v10 = vld [vmem:[#allocation3] sm:$0xff]  ;;  %2637 = vmatprep.subr.msk.bf16.mxu0 %vm309_vm0, %v2958_v8  ;;  %v311_v11 = vsel %vm309_vm0, %v2960_v9, 0  ;;  %s2617_s16 = sshll.u32 %s3396_s28, 4  ;;  %s2618_s16 = int_to_ptr.vmem [resolvable:$true] %s2617_s16 }
  0x86   :  { %383 = vmatprep.subr.bf16.mxu1 %v2955_v6  ;;  %317 = vmatpush1.bf16.msra.mxu0 %v311_v11  ;;  %v296_v12 = vpack.c.bf16 %v159_v10, %v159_v10  ;;  %v3594_v13 = vld [vmem:[#allocation11] sm:$0xff]  ;;  %v168_v15 = vld [vmem:[#allocation11 + $0x8] sm:$0xff]  ;;  %v142_v10 = vlaneseq }
  0x87   :  { %v3596_v14 = vld [vmem:[#allocation11 + $0x20] sm:$0xff]  ;;  %v172_v18 = vld [vmem:[#allocation11 + $0x28] sm:$0xff] }
  0x88   :  { %153 = vperm.xlu0 %2950, %v151_v3   ;;  %v2644_v16 = vcombine.low %v3594_v13, %v3596_v14  ;;  %v2645_v17 = vcombine.high %v3594_v13, %v3596_v14  ;;  %v2646_v19 = vcombine.low %v168_v15, %v172_v18  ;;  %v2647_v20 = vcombine.high %v168_v15, %v172_v18  ;;  %v176_v21 = vld [vmem:[#allocation11 + $0x48] sm:$0xff]  ;;  %v175_v15 = vld [vmem:[#allocation11 + $0x40] sm:$0xff] }
  0x89   :  { %384 = vmatpush1.bf16.msra.mxu1 %v2957_v7  ;;  %v180_v22 = vld [vmem:[#allocation11 + $0x68] sm:$0xff]  ;;  %v143_v11 = vand.u32 127, %v142_v10  ;;  %v3394_v18 = vmov 0.0  }
  0x8a   :  { %1120 = vmatprep.subr.bf16.mxu0 %v2645_v17  ;;  %v2655_v23 = vcombine.high %v176_v21, %v180_v22  ;;  %1161 = vmatprep.subr.bf16.mxu1 %v2647_v20  ;;  %v184_v24 = vld [vmem:[#allocation11 + $0x88] sm:$0xff]  ;;  %v2654_v26 = vcombine.low %v176_v21, %v180_v22  ;;  %v179_v17 = vld [vmem:[#allocation11 + $0x60] sm:$0xff] }
  0x8b   :  { %v188_v25 = vld [vmem:[#allocation11 + $0xa8] sm:$0xff]  ;;  %v2653_v21 = vcombine.high %v175_v15, %v179_v17 }
  0x8c   :  { %2643 = vmatmul.mubr.msk.bf16.vlgmr.msra.gmra.mrb[0].mxu1 %vm377_vm1, %v296_v12  ;;  %v2663_v27 = vcombine.high %v184_v24, %v188_v25  ;;  %v192_v28 = vld [vmem:[#allocation11 + $0xc8] sm:$0xff]  ;;  %v2662_v30 = vcombine.low %v184_v24, %v188_v25  ;;  %v187_v24 = vld [vmem:[#allocation11 + $0xa0] sm:$0xff] }
  0x8d   :  { %1162 = vmatpush1.bf16.msra.mxu1 %v2646_v19  ;;  %v196_v29 = vld [vmem:[#allocation11 + $0xe8] sm:$0xff] }
  0x8e   :  { %1163 = vmatprep.subr.bf16.mxu1 %v2655_v23  ;;  %v2671_v31 = vcombine.high %v192_v28, %v196_v29  ;;  %v200_v32 = vld [vmem:[#allocation11 + $0x108] sm:$0xff]  ;;  %v2670_v34 = vcombine.low %v192_v28, %v196_v29  ;;  %v183_v23 = vld [vmem:[#allocation11 + $0x80] sm:$0xff] }
  0x8f   :  { %v204_v33 = vld [vmem:[#allocation11 + $0x128] sm:$0xff]  ;;  %v191_v28 = vld [vmem:[#allocation11 + $0xc0] sm:$0xff] }
  0x90   :  { %v2679_v35 = vcombine.high %v200_v32, %v204_v33  ;;  %v208_v36 = vld [vmem:[#allocation11 + $0x148] sm:$0xff]  ;;  %v2678_v38 = vcombine.low %v200_v32, %v204_v33  ;;  %v195_v29 = vld [vmem:[#allocation11 + $0xe0] sm:$0xff] }
  0x91   :  { %1164 = vmatpush1.bf16.msra.mxu1 %v2654_v26  ;;  %v212_v37 = vld [vmem:[#allocation11 + $0x168] sm:$0xff]  ;;  %v2652_v26 = vcombine.low %v175_v15, %v179_v17  ;;  %v199_v32 = vld [vmem:[#allocation11 + $0x100] sm:$0xff] }
  0x92   :  { %1165 = vmatprep.subr.bf16.mxu1 %v2663_v27  ;;  %v2687_v39 = vcombine.high %v208_v36, %v212_v37  ;;  %v216_v40 = vld [vmem:[#allocation11 + $0x188] sm:$0xff]  ;;  %v2686_v42 = vcombine.low %v208_v36, %v212_v37  ;;  %v2661_v27 = vcombine.high %v183_v23, %v187_v24  ;;  %v203_v33 = vld [vmem:[#allocation11 + $0x120] sm:$0xff] }
  0x93   :  { %v220_v41 = vld [vmem:[#allocation11 + $0x1a8] sm:$0xff]  ;;  %v207_v36 = vld [vmem:[#allocation11 + $0x140] sm:$0xff]  ;;  %v2676_v13 = vcombine.low %v199_v32, %v203_v33 }
  0x94   :  { %v2695_v43 = vcombine.high %v216_v40, %v220_v41  ;;  %v224_v44 = vld [vmem:[#allocation11 + $0x1c8] sm:$0xff]  ;;  %v2694_v46 = vcombine.low %v216_v40, %v220_v41  ;;  %v211_v37 = vld [vmem:[#allocation11 + $0x160] sm:$0xff] }
  0x95   :  { %1166 = vmatpush1.bf16.msra.mxu1 %v2662_v30  ;;  %v228_v45 = vld [vmem:[#allocation11 + $0x1e8] sm:$0xff]  ;;  %v2660_v30 = vcombine.low %v183_v23, %v187_v24  ;;  %v2685_v14 = vcombine.high %v207_v36, %v211_v37  ;;  %v223_v41 = vld [vmem:[#allocation11 + $0x1c0] sm:$0xff] }
  0x96   :  { %1167 = vmatprep.subr.bf16.mxu1 %v2671_v31  ;;  %v2703_v47 = vcombine.high %v224_v44, %v228_v45  ;;  %v232_v48 = vld [vmem:[#allocation11 + $0x208] sm:$0xff]  ;;  %v2702_v50 = vcombine.low %v224_v44, %v228_v45  ;;  %v2669_v31 = vcombine.high %v191_v28, %v195_v29  ;;  %v231_v45 = vld [vmem:[#allocation11 + $0x200] sm:$0xff] }
  0x97   :  { %v236_v49 = vld [vmem:[#allocation11 + $0x228] sm:$0xff] }
  0x98   :  { %v2711_v51 = vcombine.high %v232_v48, %v236_v49  ;;  %v240_v52 = vld [vmem:[#allocation11 + $0x248] sm:$0xff]  ;;  %v2710_v54 = vcombine.low %v232_v48, %v236_v49  ;;  %v239_v49 = vld [vmem:[#allocation11 + $0x240] sm:$0xff] }
  0x99   :  { %1168 = vmatpush1.bf16.msra.mxu1 %v2670_v34  ;;  %v244_v53 = vld [vmem:[#allocation11 + $0x268] sm:$0xff]  ;;  %v2668_v34 = vcombine.low %v191_v28, %v195_v29 }
  0x9a   :  { %1169 = vmatprep.subr.bf16.mxu1 %v2679_v35  ;;  %v2719_v55 = vcombine.high %v240_v52, %v244_v53  ;;  %v248_v56 = vld [vmem:[#allocation11 + $0x288] sm:$0xff]  ;;  %v2718_v58 = vcombine.low %v240_v52, %v244_v53  ;;  %v2677_v35 = vcombine.high %v199_v32, %v203_v33  ;;  %v247_v53 = vld [vmem:[#allocation11 + $0x280] sm:$0xff]  ;;  %v173_v32 = vld [vmem:[#allocation11 + $0x30] sm:$0xff] }
  0x9b   :  { %v252_v57 = vld [vmem:[#allocation11 + $0x2a8] sm:$0xff]  ;;  %v170_v33 = vld [vmem:[#allocation11 + $0x18] sm:$0xff] }
  0x9c   :  { %v2727_v59 = vcombine.high %v248_v56, %v252_v57  ;;  %v256_v60 = vld [vmem:[#allocation11 + $0x2c8] sm:$0xff]  ;;  %v2726_v62 = vcombine.low %v248_v56, %v252_v57  ;;  %v255_v57 = vld [vmem:[#allocation11 + $0x2c0] sm:$0xff] }
  0x9d   :  { %1170 = vmatpush1.bf16.msra.mxu1 %v2678_v38  ;;  %v260_v61 = vld [vmem:[#allocation11 + $0x2e8] sm:$0xff]  ;;  %v219_v38 = vld [vmem:[#allocation11 + $0x1a0] sm:$0xff] }
  0x9e   :  { %1171 = vmatprep.subr.bf16.mxu1 %v2687_v39  ;;  %v2735_v63 = vcombine.high %v256_v60, %v260_v61  ;;  %v264_v0 = vld [vmem:[#allocation11 + $0x308] sm:$0xff]  ;;  %v2734_v3 = vcombine.low %v256_v60, %v260_v61  ;;  %v2684_v39 = vcombine.low %v207_v36, %v211_v37  ;;  %v263_v61 = vld [vmem:[#allocation11 + $0x300] sm:$0xff]  ;;  %v174_v36 = vld [vmem:[#allocation11 + $0x38] sm:$0xff] }
  0x9f   :  { %v268_v2 = vld [vmem:[#allocation11 + $0x328] sm:$0xff] }
  0xa0   :  { %v2743_v4 = vcombine.high %v264_v0, %v268_v2  ;;  %v2742_v5 = vcombine.low %v264_v0, %v268_v2  ;;  %v272_v6 = vld [vmem:[#allocation11 + $0x348] sm:$0xff]  ;;  %v271_v2 = vld [vmem:[#allocation11 + $0x340] sm:$0xff] }
  0xa1   :  { %1172 = vmatpush1.bf16.msra.mxu1 %v2686_v42  ;;  %v276_v7 = vld [vmem:[#allocation11 + $0x368] sm:$0xff]  ;;  %v227_v42 = vld [vmem:[#allocation11 + $0x1e0] sm:$0xff] }
  0xa2   :  { %1173 = vmatprep.subr.bf16.mxu1 %v2695_v43  ;;  %v2750_v8 = vcombine.low %v272_v6, %v276_v7  ;;  %v2751_v9 = vcombine.high %v272_v6, %v276_v7  ;;  %v2701_v44 = vcombine.high %v223_v41, %v227_v42  ;;  %v279_v7 = vld [vmem:[#allocation11 + $0x380] sm:$0xff]  ;;  %v292_v24 = vld [vmem:[#allocation11 + $0x3e8] sm:$0xff] }
  0xa5   :  { %1174 = vmatpush1.bf16.msra.mxu1 %v2694_v46  ;;  %v235_v46 = vld [vmem:[#allocation11 + $0x220] sm:$0xff] }
  0xa6   :  { %1175 = vmatprep.subr.bf16.mxu1 %v2703_v47  ;;  %v2700_v47 = vcombine.low %v223_v41, %v227_v42  ;;  %v2709_v48 = vcombine.high %v231_v45, %v235_v46 }
  0xa9   :  { %1176 = vmatpush1.bf16.msra.mxu1 %v2702_v50  ;;  %v243_v50 = vld [vmem:[#allocation11 + $0x260] sm:$0xff] }
  0xaa   :  { %1177 = vmatprep.subr.bf16.mxu1 %v2711_v51  ;;  %v2708_v51 = vcombine.low %v231_v45, %v235_v46  ;;  %v2717_v52 = vcombine.high %v239_v49, %v243_v50 }
  0xad   :  { %1178 = vmatpush1.bf16.msra.mxu1 %v2710_v54  ;;  %v251_v54 = vld [vmem:[#allocation11 + $0x2a0] sm:$0xff] }
  0xae   :  { %1179 = vmatprep.subr.bf16.mxu1 %v2719_v55  ;;  %v2716_v55 = vcombine.low %v239_v49, %v243_v50  ;;  %v2725_v56 = vcombine.high %v247_v53, %v251_v54 }
  0xb1   :  { %1180 = vmatpush1.bf16.msra.mxu1 %v2718_v58  ;;  %v259_v58 = vld [vmem:[#allocation11 + $0x2e0] sm:$0xff] }
  0xb2   :  { %1181 = vmatprep.subr.bf16.mxu1 %v2727_v59  ;;  %v2724_v59 = vcombine.low %v247_v53, %v251_v54  ;;  %v2733_v60 = vcombine.high %v255_v57, %v259_v58  ;;  %v177_v53 = vld [vmem:[#allocation11 + $0x50] sm:$0xff] }
  0xb3   :  { %v181_v54 = vld [vmem:[#allocation11 + $0x70] sm:$0xff] }
  0xb5   :  { %1182 = vmatpush1.bf16.msra.mxu1 %v2726_v62  ;;  %v267_v62 = vld [vmem:[#allocation11 + $0x320] sm:$0xff] }
  0xb6   :  { %1183 = vmatprep.subr.bf16.mxu1 %v2735_v63  ;;  %v2732_v63 = vcombine.low %v255_v57, %v259_v58  ;;  %v2741_v0 = vcombine.high %v263_v61, %v267_v62 }
  0xb9   :  { %1184 = vmatpush1.bf16.msra.mxu1 %v2734_v3  ;;  %v275_v3 = vld [vmem:[#allocation11 + $0x360] sm:$0xff] }
  0xba   :  { %1185 = vmatprep.subr.bf16.mxu1 %v2743_v4  ;;  %v2740_v4 = vcombine.low %v263_v61, %v267_v62  ;;  %v2748_v6 = vcombine.low %v271_v2, %v275_v3  ;;  %v189_v62 = vld [vmem:[#allocation11 + $0xb0] sm:$0xff] }
  0xbd   :  { %1186 = vmatpush1.bf16.msra.mxu1 %v2742_v5  ;;  %v2749_v5 = vcombine.high %v271_v2, %v275_v3  ;;  %v2656_v2 = vcombine.low %v177_v53, %v181_v54 }
  0xbe   :  { %1187 = vmatprep.subr.bf16.mxu1 %v2751_v9  ;;  %v280_v9 = vld [vmem:[#allocation11 + $0x388] sm:$0xff] }
  0xc1   :  { %1188 = vmatpush1.bf16.msra.mxu1 %v2750_v8  ;;  %v283_v8 = vld [vmem:[#allocation11 + $0x3a0] sm:$0xff] }
  0xc2   :  { %v2756_v15 = vcombine.low %v279_v7, %v283_v8 }
 0x103   :  { %v146_v12 = vpop.permute.xlu0 %145 }
 0x104   :  { %vm147_vm2 = vcmp.eq.s32.totalorder %v146_v12, %v143_v11  ;;  %v284_v12 = vld [vmem:[#allocation11 + $0x3a8] sm:$0xff] }
 0x105   :  { %v2633_v19 = vsel %vm147_vm2, 1.0, %v3394_v18  ;;  %v2758_v17 = vcombine.low %v280_v9, %v284_v12 }
 0x106   :  { %v3603_v20 = vpack.c.bf16 %v2633_v19, %v2633_v19  ;;  %v287_v19 = vld [vmem:[#allocation11 + $0x3c0] sm:$0xff] }
 0x107   :  { %v154_v22 = vpop.permute.xlu0 %153 }
 0x108   :  { %vm155_vm4 = vcmp.eq.s32.totalorder %v154_v22, %v143_v11  ;;  %2638 = vmatmul.mubr.msk.bf16.vlgmr.msra.gmra.mrb[0].mxu0 %vm305_vm3, %v3603_v20  ;;  %v2757_v11 = vcombine.high %v279_v7, %v283_v8  ;;  %v288_v22 = vld [vmem:[#allocation11 + $0x3c8] sm:$0xff]  ;;  %v197_v7 = vld [vmem:[#allocation11 + $0xf0] sm:$0xff]  ;;  %v194_v8 = vld [vmem:[#allocation11 + $0xd8] sm:$0xff] }
 0x109   :  { %v3607_v25 = vsel %vm155_vm4, 1.0, %v3394_v18  ;;  %1121 = vmatpush1.bf16.msra.mxu0 %v2644_v16  ;;  %v215_v16 = vld [vmem:[#allocation11 + $0x180] sm:$0xff]  ;;  %v2759_v18 = vcombine.high %v280_v9, %v284_v12  ;;  %v2767_v28 = vcombine.high %v288_v22, %v292_v24  ;;  %v198_v9 = vld [vmem:[#allocation11 + $0xf8] sm:$0xff] }
 0x10a   :  { %4132 = vst [vmem:[#allocation24_spill] sm:$0xff] %v3607_v25  ;;  %1122 = vmatprep.subr.bf16.mxu0 %v2653_v21  ;;  %v2693_v40 = vcombine.high %v215_v16, %v219_v38  ;;  %v2692_v43 = vcombine.low %v215_v16, %v219_v38  ;;  %v291_v21 = vld [vmem:[#allocation11 + $0x3e0] sm:$0xff]  ;;  %v2651_v16 = vcombine.high %v170_v33, %v174_v36  ;;  %v3613_v38 = vshrl.u32 %v142_v10, 7 }
 0x10b   :  { %1189 = vmatprep.subr.bf16.mxu1 %v2759_v18  ;;  %v2765_v23 = vcombine.high %v287_v19, %v291_v21  ;;  %v201_v18 = vld [vmem:[#allocation11 + $0x110] sm:$0xff] }
 0x10c   :  { %1190 = vmatpush1.bf16.msra.mxu1 %v2758_v17  ;;  %v3619_v41 = vsub.s32 1, %v3613_v38  ;;  %v2675_v17 = vcombine.high %v194_v8, %v198_v9 }
 0x10d   :  { %1123 = vmatpush1.bf16.msra.mxu0 %v2652_v26  ;;  %v2764_v26 = vcombine.low %v287_v19, %v291_v21  ;;  %1191 = vmatprep.subr.bf16.mxu1 %v2767_v28  ;;  %v205_v19 = vld [vmem:[#allocation11 + $0x130] sm:$0xff]  ;;  %v202_v21 = vld [vmem:[#allocation11 + $0x118] sm:$0xff] }
 0x10e   :  { %1124 = vmatprep.subr.bf16.mxu0 %v2661_v27  ;;  %v2766_v27 = vcombine.low %v288_v22, %v292_v24  ;;  %4134 = vst [vmem:[#allocation26_spill] sm:$0xff] %v3619_v41  ;;  %v206_v22 = vld [vmem:[#allocation11 + $0x138] sm:$0xff]  ;;  %v2674_v24 = vcombine.low %v194_v8, %v198_v9  ;;  %v209_v28 = vld [vmem:[#allocation11 + $0x150] sm:$0xff] }
 0x10f   :  { %v254_v8 = vld [vmem:[#allocation11 + $0x2b8] sm:$0xff] }
 0x110   :  { %1192 = vmatpush1.bf16.msra.mxu1 %v2766_v27  ;;  %v2683_v27 = vcombine.high %v202_v21, %v206_v22 }
 0x111   :  { %1125 = vmatpush1.bf16.msra.mxu0 %v2660_v30  ;;  %1243 = vmatprep.subr.bf16.mxu1 %v2651_v16 }
 0x112   :  { %1126 = vmatprep.subr.bf16.mxu0 %v2669_v31  ;;  %v169_v31 = vld [vmem:[#allocation11 + $0x10] sm:$0xff] }
 0x115   :  { %1127 = vmatpush1.bf16.msra.mxu0 %v2668_v34 }
 0x116   :  { %1128 = vmatprep.subr.bf16.mxu0 %v2677_v35  ;;  %v2649_v35 = vcombine.high %v169_v31, %v173_v32 }
 0x119   :  { %1129 = vmatpush1.bf16.msra.mxu0 %v2676_v13  ;;  %v2648_v13 = vcombine.low %v169_v31, %v173_v32  ;;  %v214_v31 = vld [vmem:[#allocation11 + $0x178] sm:$0xff]  ;;  %v2680_v32 = vcombine.low %v201_v18, %v205_v19 }
 0x11a   :  { %1130 = vmatprep.subr.bf16.mxu0 %v2685_v14  ;;  %v2650_v14 = vcombine.low %v170_v33, %v174_v36  ;;  %v2682_v33 = vcombine.low %v202_v21, %v206_v22  ;;  %v217_v36 = vld [vmem:[#allocation11 + $0x190] sm:$0xff]  ;;  %v262_v21 = vld [vmem:[#allocation11 + $0x2f8] sm:$0xff] }
 0x11d   :  { %1131 = vmatpush1.bf16.msra.mxu0 %v2684_v39  ;;  %v3616_v39 = vsub.s32 0, %v3613_v38 }
 0x11e   :  { %1132 = vmatprep.subr.bf16.mxu0 %v2693_v40  ;;  %v166_v40 = vld [vmem:[#allocation9] sm:$0x3] }
 0x11f   :  { %4133 = vst [vmem:[#allocation25_spill] sm:$0xff] %v3616_v39  ;;  %v426_v42 = vrot.slane %v166_v40, %v3616_v39 }
 0x121   :  { %1133 = vmatpush1.bf16.msra.mxu0 %v2692_v43 }
 0x122   :  { %1134 = vmatprep.subr.bf16.mxu0 %v2701_v44  ;;  %v430_v44 = vrot.slane %v166_v40, %v3619_v41 }
 0x125   :  { %1135 = vmatpush1.bf16.msra.mxu0 %v2700_v47 }
 0x126   :  { %1136 = vmatprep.subr.bf16.mxu0 %v2709_v48 }
 0x129   :  { %1137 = vmatpush1.bf16.msra.mxu0 %v2708_v51 }
 0x12a   :  { %1138 = vmatprep.subr.bf16.mxu0 %v2717_v52 }
 0x12d   :  { %1139 = vmatpush1.bf16.msra.mxu0 %v2716_v55  ;;  %v178_v55 = vld [vmem:[#allocation11 + $0x58] sm:$0xff] }
 0x12e   :  { %1140 = vmatprep.subr.bf16.mxu0 %v2725_v56  ;;  %v182_v56 = vld [vmem:[#allocation11 + $0x78] sm:$0xff] }
 0x12f   :  { %v2659_v61 = vcombine.high %v178_v55, %v182_v56  ;;  %v2658_v3 = vcombine.low %v178_v55, %v182_v56 }
 0x131   :  { %1141 = vmatpush1.bf16.msra.mxu0 %v2724_v59  ;;  %v185_v59 = vld [vmem:[#allocation11 + $0x90] sm:$0xff] }
 0x132   :  { %1142 = vmatprep.subr.bf16.mxu0 %v2733_v60  ;;  %v2657_v60 = vcombine.high %v177_v53, %v181_v54  ;;  %v234_v53 = vld [vmem:[#allocation11 + $0x218] sm:$0xff] }
 0x133   :  { %v238_v54 = vld [vmem:[#allocation11 + $0x238] sm:$0xff] }
 0x135   :  { %1143 = vmatpush1.bf16.msra.mxu0 %v2732_v63  ;;  %v186_v63 = vld [vmem:[#allocation11 + $0x98] sm:$0xff] }
 0x136   :  { %1144 = vmatprep.subr.bf16.mxu0 %v2741_v0  ;;  %v190_v0 = vld [vmem:[#allocation11 + $0xb8] sm:$0xff] }
 0x137   :  { %v2666_v12 = vcombine.low %v186_v63, %v190_v0 }
 0x139   :  { %1145 = vmatpush1.bf16.msra.mxu0 %v2740_v4  ;;  %v2665_v4 = vcombine.high %v185_v59, %v189_v62 }
 0x13a   :  { %1146 = vmatprep.subr.bf16.mxu0 %v2749_v5  ;;  %v2667_v5 = vcombine.high %v186_v63, %v190_v0  ;;  %v246_v63 = vld [vmem:[#allocation11 + $0x278] sm:$0xff] }
 0x13d   :  { %1147 = vmatpush1.bf16.msra.mxu0 %v2748_v6  ;;  %v193_v6 = vld [vmem:[#allocation11 + $0xd0] sm:$0xff] }
 0x13e   :  { %1148 = vmatprep.subr.bf16.mxu0 %v2757_v11  ;;  %v2664_v11 = vcombine.low %v185_v59, %v189_v62  ;;  %v2715_v59 = vcombine.high %v234_v53, %v238_v54  ;;  %v242_v62 = vld [vmem:[#allocation11 + $0x258] sm:$0xff] }
 0x141   :  { %1149 = vmatpush1.bf16.msra.mxu0 %v2756_v15  ;;  %v2673_v15 = vcombine.high %v193_v6, %v197_v7 }
 0x142   :  { %1150 = vmatprep.subr.bf16.mxu0 %v2765_v23  ;;  %v2672_v23 = vcombine.low %v193_v6, %v197_v7  ;;  %v253_v6 = vld [vmem:[#allocation11 + $0x2b0] sm:$0xff]  ;;  %v250_v7 = vld [vmem:[#allocation11 + $0x298] sm:$0xff] }
 0x145   :  { %1151 = vmatpush1.bf16.msra.mxu0 %v2764_v26  ;;  %v2681_v26 = vcombine.high %v201_v18, %v205_v19  ;;  %v261_v18 = vld [vmem:[#allocation11 + $0x2f0] sm:$0xff]  ;;  %v258_v19 = vld [vmem:[#allocation11 + $0x2d8] sm:$0xff] }
 0x146   :  { %1202 = vmatprep.subr.bf16.mxu0 %v2649_v35 }
 0x15f   :  { %v415_v29 = vpop.f32.mrb[0].mxu1 }
 0x160   :  { %v417_v30 = vpop.f32.mrb[1].mxu1 }
 0x161   :  { %v419_v34 = vpop.f32.mrb[2].mxu1 }
 0x162   :  { %v420_v37 = vpop.f32.mrb[3].mxu1 }
 0x163   :  { %v221_v37 = vld [vmem:[#allocation11 + $0x1b0] sm:$0xff] }
 0x1db   :  { %v350_v43 = vpop.f32.mrb[0].mxu0 }
 0x1dc   :  { %v416_v45 = vadd.f32 %v415_v29, %v350_v43  ;;  %v352_v46 = vpop.f32.mrb[1].mxu0  ;;  %v213_v29 = vld [vmem:[#allocation11 + $0x170] sm:$0xff] }
 0x1dd   :  { %v418_v47 = vadd.f32 %v417_v30, %v352_v46  ;;  %v354_v48 = vpop.f32.mrb[2].mxu0  ;;  %v210_v30 = vld [vmem:[#allocation11 + $0x158] sm:$0xff]  ;;  %v2689_v34 = vcombine.high %v209_v28, %v213_v29  ;;  %v2688_v16 = vcombine.low %v209_v28, %v213_v29  ;;  %v269_v28 = vld [vmem:[#allocation11 + $0x330] sm:$0xff] }
 0x1de   :  { %v433_v49 = vadd.f32 %v426_v42, %v416_v45  ;;  %v355_v50 = vpop.f32.mrb[3].mxu0  ;;  %v2691_v35 = vcombine.high %v210_v30, %v214_v31  ;;  %v2690_v40 = vcombine.low %v210_v30, %v214_v31  ;;  %v2697_v42 = vcombine.high %v217_v36, %v221_v37  ;;  %v229_v45 = vld [vmem:[#allocation11 + $0x1f0] sm:$0xff]  ;;  %v226_v46 = vld [vmem:[#allocation11 + $0x1d8] sm:$0xff] }
 0x1df   :  { %v434_v10 = vadd.f32 %v430_v44, %v418_v47  ;;  %v225_v44 = vld [vmem:[#allocation11 + $0x1d0] sm:$0xff]  ;;  %v230_v47 = vld [vmem:[#allocation11 + $0x1f8] sm:$0xff]  ;;  %v2696_v48 = vcombine.low %v217_v36, %v221_v37 }
 0x1e0   :  { %v435_v51 = vmax.f32 %v433_v49, 0.0  ;;  %v2705_v50 = vcombine.high %v225_v44, %v229_v45  ;;  %v2704_v55 = vcombine.low %v225_v44, %v229_v45  ;;  %v2706_v56 = vcombine.low %v226_v46, %v230_v47  ;;  %v266_v29 = vld [vmem:[#allocation11 + $0x318] sm:$0xff]  ;;  %v277_v36 = vld [vmem:[#allocation11 + $0x370] sm:$0xff] }
 0x1e1   :  { %v436_v52 = vmax.f32 %v434_v10, 0.0  ;;  %v2707_v10 = vcombine.high %v226_v46, %v230_v47  ;;  %v270_v30 = vld [vmem:[#allocation11 + $0x338] sm:$0xff]  ;;  %v285_v44 = vld [vmem:[#allocation11 + $0x3b0] sm:$0xff] }
 0x1e2   :  { %v3623_v58 = vpack.c.bf16 %v435_v51, %v435_v51  ;;  %v233_v51 = vld [vmem:[#allocation11 + $0x210] sm:$0xff]  ;;  %v274_v37 = vld [vmem:[#allocation11 + $0x358] sm:$0xff] }
 0x1e3   :  { %v438_v57 = vpack.c.bf16 %v436_v52, %v436_v52  ;;  %v237_v52 = vld [vmem:[#allocation11 + $0x230] sm:$0xff]  ;;  %v282_v45 = vld [vmem:[#allocation11 + $0x398] sm:$0xff] }
 0x1e4   :  { %v2712_v0 = vcombine.low %v233_v51, %v237_v52  ;;  %v286_v46 = vld [vmem:[#allocation11 + $0x3b8] sm:$0xff] }
 0x1e5   :  { %1152 = vmatprep.mubr.bf16.mxu0 %v438_v57  ;;  %1193 = vmatprep.mubr.bf16.mxu1 %v438_v57 }
 0x1e6   :  { %1153 = vmatmul.mubr.bf16.vlgmr.msra.gmra.mrb[4].mxu0 %v3623_v58  ;;  %1194 = vmatmul.mubr.bf16.vlgmr.msra.gmra.mrb[4].mxu1 %v3623_v58 }
 0x1e7   :  { %1203 = vmatpush1.bf16.msra.mxu0 %v2648_v13  ;;  %1244 = vmatpush1.bf16.msra.mxu1 %v2650_v14  ;;  %v218_v13 = vld [vmem:[#allocation11 + $0x198] sm:$0xff] }
 0x1e8   :  { %1234 = vmatprep.mubr.bf16.mxu0 %v438_v57  ;;  %1275 = vmatprep.mubr.bf16.mxu1 %v438_v57  ;;  %v222_v14 = vld [vmem:[#allocation11 + $0x1b8] sm:$0xff]  ;;  %v2713_v57 = vcombine.high %v233_v51, %v237_v52  ;;  %v293_v51 = vld [vmem:[#allocation11 + $0x3f0] sm:$0xff] }
 0x1e9   :  { %1204 = vmatprep.subr.bf16.mxu0 %v2657_v60  ;;  %1245 = vmatprep.subr.bf16.mxu1 %v2659_v61  ;;  %v2699_v43 = vcombine.high %v218_v13, %v222_v14  ;;  %v2698_v49 = vcombine.low %v218_v13, %v222_v14  ;;  %v241_v60 = vld [vmem:[#allocation11 + $0x250] sm:$0xff]  ;;  %v278_v13 = vld [vmem:[#allocation11 + $0x378] sm:$0xff] }
 0x1ea   :  { %v245_v61 = vld [vmem:[#allocation11 + $0x270] sm:$0xff]  ;;  %v290_v52 = vld [vmem:[#allocation11 + $0x3d8] sm:$0xff] }
 0x1eb   :  { %1205 = vmatpush1.bf16.msra.mxu0 %v2656_v2  ;;  %1246 = vmatpush1.bf16.msra.mxu1 %v2658_v3  ;;  %v2714_v2 = vcombine.low %v234_v53, %v238_v54  ;;  %v2721_v3 = vcombine.high %v241_v60, %v245_v61  ;;  %v2720_v9 = vcombine.low %v241_v60, %v245_v61  ;;  %v294_v53 = vld [vmem:[#allocation11 + $0x3f8] sm:$0xff]  ;;  %v3630_v61 = vld [vmem:[%s4117_s9 + $0x4] ss:$8 sps:$4 sm:$0x1f]  }
 0x1ec   :  { %1206 = vmatprep.subr.bf16.mxu0 %v2665_v4  ;;  %1247 = vmatprep.subr.bf16.mxu1 %v2667_v5  ;;  %v2723_v4 = vcombine.high %v242_v62, %v246_v63  ;;  %v249_v5 = vld [vmem:[#allocation11 + $0x290] sm:$0xff]  ;;  %v2770_v60 = vcombine.low %v290_v52, %v294_v53  ;;  %4135 = vst [vmem:[#allocation27_spill] sm:$0xff] %v3630_v61 }
 0x1ed   :  { %v2728_v22 = vcombine.low %v249_v5, %v253_v6 }
 0x1ef   :  { %1207 = vmatpush1.bf16.msra.mxu0 %v2664_v11  ;;  %1248 = vmatpush1.bf16.msra.mxu1 %v2666_v12  ;;  %v2722_v11 = vcombine.low %v242_v62, %v246_v63  ;;  %v2729_v12 = vcombine.high %v249_v5, %v253_v6  ;;  %v2963_v62 = vld [vmem:[%s4117_s9] ss:$8 sps:$4 sm:$0x1f]   ;;  %v2967_v5 = vld [vmem:[#allocation14 + $0x10] ss:$8 sps:$4 sm:$0xff]  }
 0x1f0   :  { %1208 = vmatprep.subr.bf16.mxu0 %v2673_v15  ;;  %1249 = vmatprep.subr.bf16.mxu1 %v2675_v17  ;;  %v2731_v15 = vcombine.high %v250_v7, %v254_v8  ;;  %v257_v17 = vld [vmem:[#allocation11 + $0x2d0] sm:$0xff] }
 0x1f1   :  { %v2736_v31 = vcombine.low %v257_v17, %v261_v18  ;;  %v2966_v63 = vld [vmem:[#allocation14 + $0x4] ss:$8 sps:$4 sm:$0xff]  }
 0x1f2   :  { %v2972_v6 = vld [vmem:[#allocation14 + $0x24] ss:$8 sps:$4 sm:$0xff]  }
 0x1f3   :  { %1209 = vmatpush1.bf16.msra.mxu0 %v2672_v23  ;;  %1250 = vmatpush1.bf16.msra.mxu1 %v2674_v24  ;;  %v2730_v23 = vcombine.low %v250_v7, %v254_v8  ;;  %v2737_v24 = vcombine.high %v257_v17, %v261_v18  ;;  %v2970_v8 = vld [vmem:[#allocation14 + $0x20] ss:$8 sps:$4 sm:$0xff]   ;;  %v2984_v17 = vld [vmem:[#allocation14 + $0x64] ss:$8 sps:$4 sm:$0xff]  }
 0x1f4   :  { %1210 = vmatprep.subr.bf16.mxu0 %v2681_v26  ;;  %1251 = vmatprep.subr.bf16.mxu1 %v2683_v27  ;;  %v2739_v26 = vcombine.high %v258_v19, %v262_v21  ;;  %v265_v27 = vld [vmem:[#allocation11 + $0x310] sm:$0xff] }
 0x1f5   :  { %v2744_v14 = vcombine.low %v265_v27, %v269_v28  ;;  %v2982_v18 = vld [vmem:[#allocation14 + $0x60] ss:$8 sps:$4 sm:$0xff]  }
 0x1f7   :  { %1211 = vmatpush1.bf16.msra.mxu0 %v2680_v32  ;;  %1252 = vmatpush1.bf16.msra.mxu1 %v2682_v33  ;;  %v2738_v32 = vcombine.low %v258_v19, %v262_v21  ;;  %v2745_v33 = vcombine.high %v265_v27, %v269_v28  ;;  %v2987_v19 = vld [vmem:[#allocation14 + $0x74] ss:$8 sps:$4 sm:$0xff]   ;;  %v2985_v21 = vld [vmem:[#allocation14 + $0x70] ss:$8 sps:$4 sm:$0xff]   ;;  %v2996_v27 = vld [vmem:[#allocation14 + $0xa4] ss:$8 sps:$4 sm:$0xff]  }
 0x1f8   :  { %1212 = vmatprep.subr.bf16.mxu0 %v2689_v34  ;;  %1253 = vmatprep.subr.bf16.mxu1 %v2691_v35  ;;  %v2747_v34 = vcombine.high %v266_v29, %v270_v30  ;;  %v273_v35 = vld [vmem:[#allocation11 + $0x350] sm:$0xff] }
 0x1f9   :  { %v2752_v47 = vcombine.low %v273_v35, %v277_v36  ;;  %v2994_v28 = vld [vmem:[#allocation14 + $0xa0] ss:$8 sps:$4 sm:$0xff]  }
 0x1fb   :  { %1213 = vmatpush1.bf16.msra.mxu0 %v2688_v16  ;;  %1254 = vmatpush1.bf16.msra.mxu1 %v2690_v40  ;;  %v2746_v16 = vcombine.low %v266_v29, %v270_v30  ;;  %v2753_v40 = vcombine.high %v273_v35, %v277_v36  ;;  %v2999_v29 = vld [vmem:[#allocation14 + $0xb4] ss:$8 sps:$4 sm:$0xff]   ;;  %v2997_v30 = vld [vmem:[#allocation14 + $0xb0] ss:$8 sps:$4 sm:$0xff]   ;;  %v3008_v35 = vld [vmem:[#allocation14 + $0xe4] ss:$8 sps:$4 sm:$0xff]  }
 0x1fc   :  { %1214 = vmatprep.subr.bf16.mxu0 %v2697_v42  ;;  %1255 = vmatprep.subr.bf16.mxu1 %v2699_v43  ;;  %v2755_v42 = vcombine.high %v274_v37, %v278_v13  ;;  %v281_v43 = vld [vmem:[#allocation11 + $0x390] sm:$0xff] }
 0x1fd   :  { %v2760_v54 = vcombine.low %v281_v43, %v285_v44  ;;  %v3006_v36 = vld [vmem:[#allocation14 + $0xe0] ss:$8 sps:$4 sm:$0xff]  }
 0x1ff   :  { %1215 = vmatpush1.bf16.msra.mxu0 %v2696_v48  ;;  %1256 = vmatpush1.bf16.msra.mxu1 %v2698_v49  ;;  %v2754_v48 = vcombine.low %v274_v37, %v278_v13  ;;  %v2761_v49 = vcombine.high %v281_v43, %v285_v44  ;;  %v3011_v37 = vld [vmem:[#allocation14 + $0xf4] ss:$8 sps:$4 sm:$0xff]   ;;  %v3009_v13 = vld [vmem:[#allocation14 + $0xf0] ss:$8 sps:$4 sm:$0xff]   ;;  %v3646_v43 = vld [vmem:[#allocation14 + $0x100] ss:$8 sps:$4 sm:$0xff]  }
 0x200   :  { %1216 = vmatprep.subr.bf16.mxu0 %v2705_v50  ;;  %1257 = vmatprep.subr.bf16.mxu1 %v2707_v10  ;;  %v2763_v50 = vcombine.high %v282_v45, %v286_v46  ;;  %v289_v10 = vld [vmem:[#allocation11 + $0x3d0] sm:$0xff] }
 0x203   :  { %1217 = vmatpush1.bf16.msra.mxu0 %v2704_v55  ;;  %1258 = vmatpush1.bf16.msra.mxu1 %v2706_v56  ;;  %v2762_v55 = vcombine.low %v282_v45, %v286_v46  ;;  %v2769_v56 = vcombine.high %v289_v10, %v293_v51  ;;  %v3648_v45 = vld [vmem:[#allocation14 + $0x114] ss:$8 sps:$4 sm:$0xff]   ;;  %v3651_v46 = vld [vmem:[#allocation14 + $0x110] ss:$8 sps:$4 sm:$0xff]  }
 0x204   :  { %1218 = vmatprep.subr.bf16.mxu0 %v2713_v57  ;;  %1259 = vmatprep.subr.bf16.mxu1 %v2715_v59  ;;  %v2771_v57 = vcombine.high %v290_v52, %v294_v53  ;;  %v2768_v59 = vcombine.low %v289_v10, %v293_v51  ;;  %v3666_v10 = vld [vmem:[#allocation14 + $0x144] ss:$8 sps:$4 sm:$0xff]   ;;  %v3669_v51 = vld [vmem:[#allocation14 + $0x140] ss:$8 sps:$4 sm:$0xff]   ;;  %v3672_v52 = vld [vmem:[#allocation14 + $0x154] ss:$8 sps:$4 sm:$0xff]  }
 0x205   :  { %v3675_v53 = vld [vmem:[#allocation14 + $0x150] ss:$8 sps:$4 sm:$0xff]  }
 0x207   :  { %1219 = vmatpush1.bf16.msra.mxu0 %v2712_v0  ;;  %1260 = vmatpush1.bf16.msra.mxu1 %v2714_v2  ;;  %v3638_v0 = vsel %vm309_vm0, %v2963_v62, 0  ;;  %v2964_v2 = vld [vmem:[#allocation14] ss:$8 sps:$4 sm:$0xff]   ;;  %v3696_v62 = vld [vmem:[#allocation14 + $0x194] ss:$8 sps:$4 sm:$0xff]  }
 0x208   :  { %1220 = vmatprep.subr.bf16.mxu0 %v2721_v3  ;;  %1261 = vmatprep.subr.bf16.mxu1 %v2723_v4  ;;  %4136 = vst [vmem:[#allocation28_spill] sm:$0xff] %v3638_v0  ;;  %v2969_v3 = vld [vmem:[#allocation14 + $0x14] ss:$8 sps:$4 sm:$0xff]  }
 0x209   :  { %v2348_v4 = vld [vmem:[#allocation6 + $0x8] sm:$0xff] }
 0x20a   :  { %v2356_v7 = vpack.c.bf16 %v2348_v4, %v2348_v4  ;;  %v3708_v4 = vld [vmem:[#allocation14 + $0x1b4] ss:$8 sps:$4 sm:$0xff]  }
 0x20b   :  { %1221 = vmatpush1.bf16.msra.mxu0 %v2720_v9  ;;  %1262 = vmatpush1.bf16.msra.mxu1 %v2722_v11  ;;  %v2973_v9 = vld [vmem:[#allocation14 + $0x30] ss:$8 sps:$4 sm:$0xff]   ;;  %v2978_v11 = vld [vmem:[#allocation14 + $0x44] ss:$8 sps:$4 sm:$0xff]  }
 0x20c   :  { %1222 = vmatprep.subr.bf16.mxu0 %v2729_v12  ;;  %1263 = vmatprep.subr.bf16.mxu1 %v2731_v15  ;;  %v2976_v12 = vld [vmem:[#allocation14 + $0x40] ss:$8 sps:$4 sm:$0xff]   ;;  %v2981_v15 = vld [vmem:[#allocation14 + $0x54] ss:$8 sps:$4 sm:$0xff]  }
 0x20f   :  { %1223 = vmatpush1.bf16.msra.mxu0 %v2728_v22  ;;  %1264 = vmatpush1.bf16.msra.mxu1 %v2730_v23  ;;  %v2990_v22 = vld [vmem:[#allocation14 + $0x84] ss:$8 sps:$4 sm:$0xff]   ;;  %v2988_v23 = vld [vmem:[#allocation14 + $0x80] ss:$8 sps:$4 sm:$0xff]  }
 0x210   :  { %1224 = vmatprep.subr.bf16.mxu0 %v2737_v24  ;;  %1265 = vmatprep.subr.bf16.mxu1 %v2739_v26  ;;  %v2993_v24 = vld [vmem:[#allocation14 + $0x94] ss:$8 sps:$4 sm:$0xff]   ;;  %v2991_v26 = vld [vmem:[#allocation14 + $0x90] ss:$8 sps:$4 sm:$0xff]  }
 0x213   :  { %1225 = vmatpush1.bf16.msra.mxu0 %v2736_v31  ;;  %1266 = vmatpush1.bf16.msra.mxu1 %v2738_v32  ;;  %v3002_v31 = vld [vmem:[#allocation14 + $0xc4] ss:$8 sps:$4 sm:$0xff]   ;;  %v3000_v32 = vld [vmem:[#allocation14 + $0xc0] ss:$8 sps:$4 sm:$0xff]  }
 0x214   :  { %1226 = vmatprep.subr.bf16.mxu0 %v2745_v33  ;;  %1267 = vmatprep.subr.bf16.mxu1 %v2747_v34  ;;  %v3005_v33 = vld [vmem:[#allocation14 + $0xd4] ss:$8 sps:$4 sm:$0xff]   ;;  %v3003_v34 = vld [vmem:[#allocation14 + $0xd0] ss:$8 sps:$4 sm:$0xff]  }
 0x217   :  { %1227 = vmatpush1.bf16.msra.mxu0 %v2744_v14  ;;  %1268 = vmatpush1.bf16.msra.mxu1 %v2746_v16  ;;  %v3014_v14 = vld [vmem:[#allocation14 + $0x104] ss:$8 sps:$4 sm:$0xff]  }
 0x218   :  { %1228 = vmatprep.subr.bf16.mxu0 %v2753_v40  ;;  %1269 = vmatprep.subr.bf16.mxu1 %v2755_v42  ;;  %v2347_v16 = vld [vmem:[#allocation6] sm:$0xff]  ;;  %v2350_v40 = vld [vmem:[#allocation6 + $0x18] sm:$0xff] }
 0x219   :  { %v2355_v42 = vpack.c.bf16 %v2347_v16, %v2347_v16  ;;  %v2358_v44 = vpack.c.bf16 %v2350_v40, %v2350_v40 }
 0x21b   :  { %1229 = vmatpush1.bf16.msra.mxu0 %v2752_v47  ;;  %1270 = vmatpush1.bf16.msra.mxu1 %v2754_v48  ;;  %v3654_v47 = vld [vmem:[#allocation14 + $0x124] ss:$8 sps:$4 sm:$0xff]   ;;  %v3657_v48 = vld [vmem:[#allocation14 + $0x120] ss:$8 sps:$4 sm:$0xff]  }
 0x21c   :  { %1230 = vmatprep.subr.bf16.mxu0 %v2761_v49  ;;  %1271 = vmatprep.subr.bf16.mxu1 %v2763_v50  ;;  %v3660_v49 = vld [vmem:[#allocation14 + $0x134] ss:$8 sps:$4 sm:$0xff]   ;;  %v3663_v50 = vld [vmem:[#allocation14 + $0x130] ss:$8 sps:$4 sm:$0xff]  }
 0x21f   :  { %1231 = vmatpush1.bf16.msra.mxu0 %v2760_v54  ;;  %1272 = vmatpush1.bf16.msra.mxu1 %v2762_v55  ;;  %v3678_v54 = vld [vmem:[#allocation14 + $0x164] ss:$8 sps:$4 sm:$0xff]   ;;  %v3681_v55 = vld [vmem:[#allocation14 + $0x160] ss:$8 sps:$4 sm:$0xff]  }
 0x220   :  { %1232 = vmatprep.subr.bf16.mxu0 %v2769_v56  ;;  %1273 = vmatprep.subr.bf16.mxu1 %v2771_v57  ;;  %v3684_v56 = vld [vmem:[#allocation14 + $0x174] ss:$8 sps:$4 sm:$0xff]   ;;  %v3687_v57 = vld [vmem:[#allocation14 + $0x170] ss:$8 sps:$4 sm:$0xff]  }
 0x223   :  { %1233 = vmatpush1.bf16.msra.mxu0 %v2768_v59  ;;  %1274 = vmatpush1.bf16.msra.mxu1 %v2770_v60  ;;  %v3690_v59 = vld [vmem:[#allocation14 + $0x184] ss:$8 sps:$4 sm:$0xff]   ;;  %v3693_v60 = vld [vmem:[#allocation14 + $0x180] ss:$8 sps:$4 sm:$0xff]  }
 0x224   :  { %2902 = vmatprep.subr.msk.bf16.mxu1 %vm309_vm0, %v3630_v61  ;;  %2084 = vmatprep.subr.bf16.mxu0 %v2966_v63  ;;  %v3908_v61 = vld [vmem:[#allocation14 + $0x340] ss:$8 sps:$4 sm:$0xff]  }
 0x226   :  { %1235 = vmatmul.mubr.bf16.vlgmr.msra.gmra.mrb[8].mxu0 %v3623_v58  ;;  %1276 = vmatmul.mubr.bf16.vlgmr.msra.gmra.mrb[8].mxu1 %v3623_v58  ;;  %v2975_v58 = vld [vmem:[#allocation14 + $0x34] ss:$8 sps:$4 sm:$0xff]  }
 0x227   :  { %2269 = vmatpush1.bf16.msra.mxu1 %v3638_v0  ;;  %2300 = vmatprep.mubr.bf16.mxu1 %v4124_v1  ;;  %v3802_v1 = vld [vmem:[#allocation14 + $0x294] ss:$8 sps:$4 sm:$0xff]  }
 0x228   :  { %2363 = vmatprep.subr.bf16.mxu1 %v2966_v63  ;;  %2085 = vmatpush1.bf16.msra.mxu0 %v2964_v2  ;;  %v3699_v63 = vld [vmem:[#allocation14 + $0x190] ss:$8 sps:$4 sm:$0xff]  }
 0x229   :  { %2086 = vmatprep.subr.bf16.mxu0 %v2969_v3 }
 0x22c   :  { %2087 = vmatpush1.bf16.msra.mxu0 %v2967_v5 }
 0x22d   :  { %2088 = vmatprep.subr.bf16.mxu0 %v2972_v6 }
 0x22e   :  { %2903 = vmatmul.mubr.msk.bf16.vlgmr.msra.gmra.mrb[12].mxu1 %vm305_vm3, %v3603_v20  ;;  %v2979_v20 = vld [vmem:[#allocation14 + $0x50] ss:$8 sps:$4 sm:$0xff]  }
 0x22f   :  { %2364 = vmatpush1.bf16.msra.mxu1 %v2964_v2  ;;  %2395 = vmatprep.mubr.bf16.mxu1 %v2356_v7  ;;  %v3702_v2 = vld [vmem:[#allocation14 + $0x1a4] ss:$8 sps:$4 sm:$0xff]   ;;  %v3717_v7 = vld [vmem:[#allocation14 + $0x1c0] ss:$8 sps:$4 sm:$0xff]  }
 0x230   :  { %2365 = vmatprep.subr.bf16.mxu1 %v2969_v3  ;;  %2089 = vmatpush1.bf16.msra.mxu0 %v2970_v8  ;;  %v3705_v3 = vld [vmem:[#allocation14 + $0x1a0] ss:$8 sps:$4 sm:$0xff]  }
 0x231   :  { %2090 = vmatprep.subr.bf16.mxu0 %v2975_v58 }
 0x233   :  { %2366 = vmatpush1.bf16.msra.mxu1 %v2967_v5  ;;  %v3711_v5 = vld [vmem:[#allocation14 + $0x1b0] ss:$8 sps:$4 sm:$0xff]  }
 0x234   :  { %2367 = vmatprep.subr.bf16.mxu1 %v2972_v6  ;;  %2091 = vmatpush1.bf16.msra.mxu0 %v2973_v9  ;;  %v3714_v6 = vld [vmem:[#allocation14 + $0x1c4] ss:$8 sps:$4 sm:$0xff]  }
 0x235   :  { %2092 = vmatprep.subr.bf16.mxu0 %v2978_v11 }
 0x237   :  { %2368 = vmatpush1.bf16.msra.mxu1 %v2970_v8  ;;  %v3720_v8 = vld [vmem:[#allocation14 + $0x1d4] ss:$8 sps:$4 sm:$0xff]  }
 0x238   :  { %2369 = vmatprep.subr.bf16.mxu1 %v2975_v58  ;;  %2093 = vmatpush1.bf16.msra.mxu0 %v2976_v12  ;;  %v3723_v58 = vld [vmem:[#allocation14 + $0x1d0] ss:$8 sps:$4 sm:$0xff]  }
 0x239   :  { %2094 = vmatprep.subr.bf16.mxu0 %v2981_v15 }
 0x23b   :  { %2370 = vmatpush1.bf16.msra.mxu1 %v2973_v9  ;;  %v3726_v9 = vld [vmem:[#allocation14 + $0x1e4] ss:$8 sps:$4 sm:$0xff]  }
 0x23c   :  { %2371 = vmatprep.subr.bf16.mxu1 %v2978_v11  ;;  %2095 = vmatpush1.bf16.msra.mxu0 %v2979_v20  ;;  %v3729_v11 = vld [vmem:[#allocation14 + $0x1e0] ss:$8 sps:$4 sm:$0xff]  }
 0x23d   :  { %2096 = vmatprep.subr.bf16.mxu0 %v2984_v17 }
 0x23f   :  { %2372 = vmatpush1.bf16.msra.mxu1 %v2976_v12  ;;  %v3732_v12 = vld [vmem:[#allocation14 + $0x1f4] ss:$8 sps:$4 sm:$0xff]  }
 0x240   :  { %2373 = vmatprep.subr.bf16.mxu1 %v2981_v15  ;;  %2097 = vmatpush1.bf16.msra.mxu0 %v2982_v18  ;;  %v3735_v15 = vld [vmem:[#allocation14 + $0x1f0] ss:$8 sps:$4 sm:$0xff]  }
 0x241   :  { %2098 = vmatprep.subr.bf16.mxu0 %v2987_v19 }
 0x243   :  { %2374 = vmatpush1.bf16.msra.mxu1 %v2979_v20  ;;  %v2349_v20 = vld [vmem:[#allocation6 + $0x10] sm:$0xff] }
 0x244   :  { %2375 = vmatprep.subr.bf16.mxu1 %v2984_v17  ;;  %2099 = vmatpush1.bf16.msra.mxu0 %v2985_v21  ;;  %v3738_v17 = vld [vmem:[#allocation14 + $0x204] ss:$8 sps:$4 sm:$0xff]  }
 0x245   :  { %2100 = vmatprep.subr.bf16.mxu0 %v2990_v22 }
 0x247   :  { %2376 = vmatpush1.bf16.msra.mxu1 %v2982_v18  ;;  %v2352_v18 = vld [vmem:[#allocation6 + $0x28] sm:$0xff] }
 0x248   :  { %2377 = vmatprep.subr.bf16.mxu1 %v2987_v19  ;;  %2101 = vmatpush1.bf16.msra.mxu0 %v2988_v23  ;;  %v2357_v19 = vpack.c.bf16 %v2349_v20, %v2349_v20 }
 0x249   :  { %2102 = vmatprep.subr.bf16.mxu0 %v2993_v24 }
 0x24b   :  { %2378 = vmatpush1.bf16.msra.mxu1 %v2985_v21  ;;  %v3741_v21 = vld [vmem:[#allocation14 + $0x200] ss:$8 sps:$4 sm:$0xff]  }
 0x24c   :  { %2379 = vmatprep.subr.bf16.mxu1 %v2990_v22  ;;  %2103 = vmatpush1.bf16.msra.mxu0 %v2991_v26  ;;  %v2360_v22 = vpack.c.bf16 %v2352_v18, %v2352_v18  ;;  %v3775_v18 = vld [vmem:[#allocation14 + $0x240] ss:$8 sps:$4 sm:$0xff]  }
 0x24d   :  { %2104 = vmatprep.subr.bf16.mxu0 %v2996_v27 }
 0x24f   :  { %2380 = vmatpush1.bf16.msra.mxu1 %v2988_v23  ;;  %v3744_v23 = vld [vmem:[#allocation14 + $0x214] ss:$8 sps:$4 sm:$0xff]  }
 0x250   :  { %2381 = vmatprep.subr.bf16.mxu1 %v2993_v24  ;;  %2105 = vmatpush1.bf16.msra.mxu0 %v2994_v28  ;;  %v3747_v24 = vld [vmem:[#allocation14 + $0x210] ss:$8 sps:$4 sm:$0xff]  }
 0x251   :  { %2106 = vmatprep.subr.bf16.mxu0 %v2999_v29 }
 0x253   :  { %2382 = vmatpush1.bf16.msra.mxu1 %v2991_v26  ;;  %v3750_v26 = vld [vmem:[#allocation14 + $0x224] ss:$8 sps:$4 sm:$0xff]  }
 0x254   :  { %2383 = vmatprep.subr.bf16.mxu1 %v2996_v27  ;;  %2107 = vmatpush1.bf16.msra.mxu0 %v2997_v30  ;;  %v3753_v27 = vld [vmem:[#allocation14 + $0x220] ss:$8 sps:$4 sm:$0xff]  }
 0x255   :  { %2108 = vmatprep.subr.bf16.mxu0 %v3002_v31 }
 0x257   :  { %2384 = vmatpush1.bf16.msra.mxu1 %v2994_v28  ;;  %v3755_v28 = vld [vmem:[#allocation12] sm:$0xff] }
 0x258   :  { %2385 = vmatprep.subr.bf16.mxu1 %v2999_v29  ;;  %2109 = vmatpush1.bf16.msra.mxu0 %v3000_v32  ;;  %v454_v29 = vsub.s32 3, %v3613_v38 }
 0x259   :  { %2110 = vmatprep.subr.bf16.mxu0 %v3005_v33 }
 0x25b   :  { %2386 = vmatpush1.bf16.msra.mxu1 %v2997_v30  ;;  %v3759_v30 = vld [vmem:[#allocation14 + $0x234] ss:$8 sps:$4 sm:$0xff]  }
 0x25c   :  { %2387 = vmatprep.subr.bf16.mxu1 %v3002_v31  ;;  %2111 = vmatpush1.bf16.msra.mxu0 %v3003_v34  ;;  %v443_v31 = vrot.slane %v3755_v28, %v3616_v39 }
 0x25d   :  { %2112 = vmatprep.subr.bf16.mxu0 %v3008_v35 }
 0x25f   :  { %2388 = vmatpush1.bf16.msra.mxu1 %v3000_v32  ;;  %v3764_v32 = vld [vmem:[#allocation14 + $0x230] ss:$8 sps:$4 sm:$0xff]  }
 0x260   :  { %2389 = vmatprep.subr.bf16.mxu1 %v3005_v33  ;;  %2113 = vmatpush1.bf16.msra.mxu0 %v3006_v36  ;;  %v447_v33 = vrot.slane %v3755_v28, %v3619_v41 }
 0x261   :  { %2114 = vmatprep.subr.bf16.mxu0 %v3011_v37 }
 0x263   :  { %2390 = vmatpush1.bf16.msra.mxu1 %v3003_v34  ;;  %v455_v34 = vrot.slane %v3755_v28, %v454_v29  ;;  %v3778_v29 = vld [vmem:[#allocation14 + $0x254] ss:$8 sps:$4 sm:$0xff]  }
 0x264   :  { %2391 = vmatprep.subr.bf16.mxu1 %v3008_v35  ;;  %2115 = vmatpush1.bf16.msra.mxu0 %v3009_v13  ;;  %v3770_v35 = vld [vmem:[#allocation14 + $0x244] ss:$8 sps:$4 sm:$0xff]  }
 0x265   :  { %2125 = vmatprep.subr.bf16.mxu0 %v3014_v14 }
 0x267   :  { %2392 = vmatpush1.bf16.msra.mxu1 %v3006_v36 }
 0x268   :  { %2393 = vmatprep.subr.bf16.mxu1 %v3011_v37 }
 0x26b   :  { %2394 = vmatpush1.bf16.msra.mxu1 %v3009_v13 }
 0x26c   :  { %2404 = vmatprep.subr.bf16.mxu1 %v3014_v14 }
 0x26e   :  { %2396 = vmatmul.mubr.bf16.vlgmr.msra.gmra.mrb[16].mxu1 %v2355_v42 }
 0x26f   :  { %2405 = vmatpush1.bf16.msra.mxu1 %v3646_v43  ;;  %2436 = vmatprep.mubr.bf16.mxu1 %v2358_v44 }
 0x270   :  { %2406 = vmatprep.subr.bf16.mxu1 %v3648_v45 }
 0x273   :  { %2407 = vmatpush1.bf16.msra.mxu1 %v3651_v46 }
 0x274   :  { %2408 = vmatprep.subr.bf16.mxu1 %v3654_v47 }
 0x277   :  { %2409 = vmatpush1.bf16.msra.mxu1 %v3657_v48 }
 0x278   :  { %2410 = vmatprep.subr.bf16.mxu1 %v3660_v49 }
 0x27b   :  { %2411 = vmatpush1.bf16.msra.mxu1 %v3663_v50 }
 0x27c   :  { %2412 = vmatprep.subr.bf16.mxu1 %v3666_v10 }
 0x27f   :  { %2413 = vmatpush1.bf16.msra.mxu1 %v3669_v51 }
 0x280   :  { %2414 = vmatprep.subr.bf16.mxu1 %v3672_v52 }
 0x283   :  { %2415 = vmatpush1.bf16.msra.mxu1 %v3675_v53 }
 0x284   :  { %2416 = vmatprep.subr.bf16.mxu1 %v3678_v54 }
 0x287   :  { %2417 = vmatpush1.bf16.msra.mxu1 %v3681_v55 }
 0x288   :  { %2418 = vmatprep.subr.bf16.mxu1 %v3684_v56 }
 0x28b   :  { %2419 = vmatpush1.bf16.msra.mxu1 %v3687_v57 }
 0x28c   :  { %2420 = vmatprep.subr.bf16.mxu1 %v3690_v59 }
 0x28f   :  { %2421 = vmatpush1.bf16.msra.mxu1 %v3693_v60 }
 0x290   :  { %2422 = vmatprep.subr.bf16.mxu1 %v3696_v62 }
 0x293   :  { %2423 = vmatpush1.bf16.msra.mxu1 %v3699_v63 }
 0x294   :  { %2424 = vmatprep.subr.bf16.mxu1 %v3702_v2 }
 0x297   :  { %2425 = vmatpush1.bf16.msra.mxu1 %v3705_v3 }
 0x298   :  { %2426 = vmatprep.subr.bf16.mxu1 %v3708_v4 }
 0x29b   :  { %2427 = vmatpush1.bf16.msra.mxu1 %v3711_v5 }
 0x29c   :  { %2428 = vmatprep.subr.bf16.mxu1 %v3714_v6 }
 0x29f   :  { %2429 = vmatpush1.bf16.msra.mxu1 %v3717_v7 }
 0x2a0   :  { %2430 = vmatprep.subr.bf16.mxu1 %v3720_v8 }
 0x2a3   :  { %2431 = vmatpush1.bf16.msra.mxu1 %v3723_v58 }
 0x2a4   :  { %2432 = vmatprep.subr.bf16.mxu1 %v3726_v9 }
 0x2a7   :  { %2433 = vmatpush1.bf16.msra.mxu1 %v3729_v11 }
 0x2a8   :  { %2434 = vmatprep.subr.bf16.mxu1 %v3732_v12 }
 0x2ab   :  { %2435 = vmatpush1.bf16.msra.mxu1 %v3735_v15 }
 0x2ac   :  { %2445 = vmatprep.subr.bf16.mxu1 %v3738_v17 }
 0x2ae   :  { %2437 = vmatmul.mubr.bf16.vlgmr.msra.gmra.mrb[16].mxu1 %v2357_v19 }
 0x2af   :  { %2446 = vmatpush1.bf16.msra.mxu1 %v3741_v21  ;;  %2477 = vmatprep.mubr.bf16.mxu1 %v2360_v22 }
 0x2b0   :  { %2447 = vmatprep.subr.bf16.mxu1 %v3744_v23 }
 0x2b3   :  { %2448 = vmatpush1.bf16.msra.mxu1 %v3747_v24 }
 0x2b4   :  { %2449 = vmatprep.subr.bf16.mxu1 %v3750_v26 }
 0x2b7   :  { %2450 = vmatpush1.bf16.msra.mxu1 %v3753_v27 }
 0x2b8   :  { %2451 = vmatprep.subr.bf16.mxu1 %v3759_v30 }
 0x2b9   :  { %v1154_v36 = vpop.f32.mrb[4].mxu0  ;;  %v3772_v37 = vpop.f32.mrb[4].mxu1 }
 0x2ba   :  { %v1155_v13 = vadd.f32 %v1154_v36, %v443_v31  ;;  %v1156_v14 = vpop.f32.mrb[5].mxu0  ;;  %v1197_v16 = vpop.f32.mrb[5].mxu1  ;;  %v3781_v31 = vld [vmem:[#allocation14 + $0x250] ss:$8 sps:$4 sm:$0xff]   ;;  %v3790_v36 = vld [vmem:[#allocation14 + $0x274] ss:$8 sps:$4 sm:$0xff]  }
 0x2bb   :  { %2452 = vmatpush1.bf16.msra.mxu1 %v3764_v32  ;;  %v1157_v40 = vadd.f32 %v1156_v14, %v447_v33  ;;  %v1198_v42 = vadd.f32 %v1197_v16, %v455_v34  ;;  %v1158_v44 = vpop.f32.mrb[6].mxu0  ;;  %v1199_v20 = vpop.f32.mrb[6].mxu1  ;;  %v3784_v33 = vld [vmem:[#allocation14 + $0x264] ss:$8 sps:$4 sm:$0xff]   ;;  %v3787_v34 = vld [vmem:[#allocation14 + $0x260] ss:$8 sps:$4 sm:$0xff]  }
 0x2bc   :  { %v1159_v19 = vpop.f32.mrb[7].mxu0  ;;  %v1200_v22 = vpop.f32.mrb[7].mxu1  ;;  %2453 = vmatprep.subr.bf16.mxu1 %v3770_v35  ;;  %3156 = vtanh.f32 %v1155_v13  ;;  %v3793_v13 = vld [vmem:[#allocation14 + $0x270] ss:$8 sps:$4 sm:$0xff]  }
 0x2bd   :  { %3158 = vtanh.f32 %v1157_v40  ;;  %v3796_v40 = vld [vmem:[#allocation14 + $0x284] ss:$8 sps:$4 sm:$0xff]   ;;  %v3799_v22 = vld [vmem:[#allocation14 + $0x280] ss:$8 sps:$4 sm:$0xff]  }
 0x2be   :  { %3160 = vtanh.f32 %v1198_v42 }
 0x2bf   :  { %2454 = vmatpush1.bf16.msra.mxu1 %v3775_v18 }
 0x2c0   :  { %2455 = vmatprep.subr.bf16.mxu1 %v3778_v29 }
 0x2c3   :  { %2456 = vmatpush1.bf16.msra.mxu1 %v3781_v31 }
 0x2c4   :  { %2457 = vmatprep.subr.bf16.mxu1 %v3784_v33 }
 0x2c6   :  { %v3157_v14 = vpop.eup %3156 }
 0x2c7   :  { %2458 = vmatpush1.bf16.msra.mxu1 %v3787_v34  ;;  %v3159_v16 = vpop.eup %3158  ;;  %v1425_v20 = vpack.c.bf16 %v3157_v14, %v3157_v14  ;;  %v3810_v14 = vld [vmem:[#allocation14 + $0x2a4] ss:$8 sps:$4 sm:$0xff]  }
 0x2c8   :  { %2459 = vmatprep.subr.bf16.mxu1 %v3790_v36  ;;  %v3161_v42 = vpop.eup %3160  ;;  %v1426_v44 = vpack.c.bf16 %v3159_v16, %v3159_v16  ;;  %v3807_v16 = vld [vmem:[#allocation14 + $0x290] ss:$8 sps:$4 sm:$0xff]  }
 0x2c9   :  { %v1428_v19 = vpack.c.bf16 %v3161_v42, %v3161_v42  ;;  %v3815_v42 = vld [vmem:[#allocation14 + $0x2a0] ss:$8 sps:$4 sm:$0xff]  }
 0x2ca   :  { %2116 = vmatprep.mubr.bf16.mxu0 %v1426_v44  ;;  %v2351_v44 = vld [vmem:[#allocation6 + $0x20] sm:$0xff] }
 0x2cb   :  { %2460 = vmatpush1.bf16.msra.mxu1 %v3793_v13  ;;  %2117 = vmatmul.mubr.bf16.vlgmr.msra.gmra.mrb[12].mxu0 %v1425_v20  ;;  %v2359_v20 = vpack.c.bf16 %v2351_v44, %v2351_v44  ;;  %v4128_v44 = vsub.s32 2, %v3613_v38 }
 0x2cc   :  { %2461 = vmatprep.subr.bf16.mxu1 %v3796_v40  ;;  %2126 = vmatpush1.bf16.msra.mxu0 %v3646_v43  ;;  %v3818_v43 = vld [vmem:[#allocation14 + $0x2b4] ss:$8 sps:$4 sm:$0xff]  }
 0x2cd   :  { %2157 = vmatprep.mubr.bf16.mxu0 %v1428_v19  ;;  %2127 = vmatprep.subr.bf16.mxu0 %v3648_v45  ;;  %v3823_v45 = vld [vmem:[#allocation14 + $0x2b0] ss:$8 sps:$4 sm:$0xff]   ;;  %v3866_v19 = vld [vmem:[#allocation14 + $0x314] ss:$8 sps:$4 sm:$0xff]  }
 0x2cf   :  { %2462 = vmatpush1.bf16.msra.mxu1 %v3799_v22 }
 0x2d0   :  { %2463 = vmatprep.subr.bf16.mxu1 %v3802_v1  ;;  %2128 = vmatpush1.bf16.msra.mxu0 %v3651_v46  ;;  %v3826_v46 = vld [vmem:[#allocation14 + $0x2c4] ss:$8 sps:$4 sm:$0xff]  }
 0x2d1   :  { %2129 = vmatprep.subr.bf16.mxu0 %v3654_v47  ;;  %v3831_v47 = vld [vmem:[#allocation14 + $0x2c0] ss:$8 sps:$4 sm:$0xff]  }
 0x2d3   :  { %2464 = vmatpush1.bf16.msra.mxu1 %v3807_v16 }
 0x2d4   :  { %2465 = vmatprep.subr.bf16.mxu1 %v3810_v14  ;;  %2130 = vmatpush1.bf16.msra.mxu0 %v3657_v48  ;;  %v3834_v48 = vld [vmem:[#allocation14 + $0x2d4] ss:$8 sps:$4 sm:$0xff]  }
 0x2d5   :  { %2131 = vmatprep.subr.bf16.mxu0 %v3660_v49  ;;  %v3839_v49 = vld [vmem:[#allocation14 + $0x2d0] ss:$8 sps:$4 sm:$0xff]  }
 0x2d7   :  { %2466 = vmatpush1.bf16.msra.mxu1 %v3815_v42 }
 0x2d8   :  { %2467 = vmatprep.subr.bf16.mxu1 %v3818_v43  ;;  %2132 = vmatpush1.bf16.msra.mxu0 %v3663_v50  ;;  %v3842_v50 = vld [vmem:[#allocation14 + $0x2e4] ss:$8 sps:$4 sm:$0xff]  }
 0x2d9   :  { %2133 = vmatprep.subr.bf16.mxu0 %v3666_v10  ;;  %v3847_v10 = vld [vmem:[#allocation14 + $0x2e0] ss:$8 sps:$4 sm:$0xff]  }
 0x2db   :  { %2468 = vmatpush1.bf16.msra.mxu1 %v3823_v45 }
 0x2dc   :  { %2469 = vmatprep.subr.bf16.mxu1 %v3826_v46  ;;  %2134 = vmatpush1.bf16.msra.mxu0 %v3669_v51  ;;  %v3850_v51 = vld [vmem:[#allocation14 + $0x2f4] ss:$8 sps:$4 sm:$0xff]  }
 0x2dd   :  { %2135 = vmatprep.subr.bf16.mxu0 %v3672_v52  ;;  %v3855_v52 = vld [vmem:[#allocation14 + $0x2f0] ss:$8 sps:$4 sm:$0xff]  }
 0x2df   :  { %2470 = vmatpush1.bf16.msra.mxu1 %v3831_v47 }
 0x2e0   :  { %2471 = vmatprep.subr.bf16.mxu1 %v3834_v48  ;;  %2136 = vmatpush1.bf16.msra.mxu0 %v3675_v53  ;;  %v3858_v53 = vld [vmem:[#allocation14 + $0x304] ss:$8 sps:$4 sm:$0xff]  }
 0x2e1   :  { %2137 = vmatprep.subr.bf16.mxu0 %v3678_v54  ;;  %v2354_v54 = vld [vmem:[#allocation6 + $0x38] sm:$0xff] }
 0x2e3   :  { %2472 = vmatpush1.bf16.msra.mxu1 %v3839_v49 }
 0x2e4   :  { %2473 = vmatprep.subr.bf16.mxu1 %v3842_v50  ;;  %2138 = vmatpush1.bf16.msra.mxu0 %v3681_v55  ;;  %v3863_v55 = vld [vmem:[#allocation14 + $0x300] ss:$8 sps:$4 sm:$0xff]  }
 0x2e5   :  { %2139 = vmatprep.subr.bf16.mxu0 %v3684_v56  ;;  %v2362_v56 = vpack.c.bf16 %v2354_v54, %v2354_v54  ;;  %v3884_v54 = vld [vmem:[#allocation14 + $0x334] ss:$8 sps:$4 sm:$0xff]  }
 0x2e6   :  { %4137 = vst [vmem:[#allocation29_spill] sm:$0xff] %v3884_v54 }
 0x2e7   :  { %2474 = vmatpush1.bf16.msra.mxu1 %v3847_v10 }
 0x2e8   :  { %2475 = vmatprep.subr.bf16.mxu1 %v3850_v51  ;;  %2140 = vmatpush1.bf16.msra.mxu0 %v3687_v57  ;;  %v3871_v57 = vld [vmem:[#allocation14 + $0x310] ss:$8 sps:$4 sm:$0xff]  }
 0x2e9   :  { %2141 = vmatprep.subr.bf16.mxu0 %v3690_v59  ;;  %v3874_v59 = vld [vmem:[#allocation14 + $0x324] ss:$8 sps:$4 sm:$0xff]  }
 0x2eb   :  { %2476 = vmatpush1.bf16.msra.mxu1 %v3855_v52 }
 0x2ec   :  { %2486 = vmatprep.subr.bf16.mxu1 %v3858_v53  ;;  %2142 = vmatpush1.bf16.msra.mxu0 %v3693_v60  ;;  %v3880_v60 = vld [vmem:[#allocation14 + $0x320] ss:$8 sps:$4 sm:$0xff]  }
 0x2ed   :  { %2143 = vmatprep.subr.bf16.mxu0 %v3696_v62  ;;  %v462_v62 = vsub.s32 5, %v3613_v38 }
 0x2ee   :  { %2478 = vmatmul.mubr.bf16.vlgmr.msra.gmra.mrb[16].mxu1 %v2359_v20  ;;  %v451_v20 = vrot.slane %v3755_v28, %v4128_v44 }
 0x2ef   :  { %2487 = vmatpush1.bf16.msra.mxu1 %v3863_v55  ;;  %2518 = vmatprep.mubr.bf16.mxu1 %v2362_v56  ;;  %v3896_v56 = vld [vmem:[#allocation14 + $0x344] ss:$8 sps:$4 sm:$0xff]  }
 0x2f0   :  { %2488 = vmatprep.subr.bf16.mxu1 %v3866_v19  ;;  %2144 = vmatpush1.bf16.msra.mxu0 %v3699_v63  ;;  %v3892_v63 = vld [vmem:[#allocation14 + $0x330] ss:$8 sps:$4 sm:$0xff]   ;;  %v1196_v41 = vadd.f32 %v3772_v37, %v451_v20 }
 0x2f1   :  { %2145 = vmatprep.subr.bf16.mxu0 %v3702_v2  ;;  %v463_v2 = vrot.slane %v3755_v28, %v462_v62 }
 0x2f2   :  { %3162 = vtanh.f32 %v1196_v41  ;;  %v3928_v41 = vld [vmem:[#allocation14 + $0x360] ss:$8 sps:$4 sm:$0xff]  }
 0x2f3   :  { %2489 = vmatpush1.bf16.msra.mxu1 %v3871_v57 }
 0x2f4   :  { %2490 = vmatprep.subr.bf16.mxu1 %v3874_v59  ;;  %2146 = vmatpush1.bf16.msra.mxu0 %v3705_v3 }
 0x2f5   :  { %2147 = vmatprep.subr.bf16.mxu0 %v3708_v4 }
 0x2f7   :  { %2491 = vmatpush1.bf16.msra.mxu1 %v3880_v60 }
 0x2f8   :  { %2492 = vmatprep.subr.bf16.mxu1 %v3884_v54  ;;  %2148 = vmatpush1.bf16.msra.mxu0 %v3711_v5  ;;  %v3911_v5 = vld [vmem:[#allocation14 + $0x354] ss:$8 sps:$4 sm:$0xff]  }
 0x2f9   :  { %v3900_v39 = vpop.f32.mrb[8].mxu0  ;;  %v3902_v44 = vpop.f32.mrb[8].mxu1  ;;  %2149 = vmatprep.subr.bf16.mxu0 %v3714_v6  ;;  %v3916_v6 = vld [vmem:[#allocation14 + $0x350] ss:$8 sps:$4 sm:$0xff]  }
 0x2fa   :  { %v1238_v3 = vpop.f32.mrb[9].mxu0  ;;  %v3904_v4 = vpop.f32.mrb[9].mxu1 }
 0x2fb   :  { %v1239_v25 = vadd.f32 %v1238_v3, %v463_v2  ;;  %2493 = vmatpush1.bf16.msra.mxu1 %v3892_v63  ;;  %v1240_v62 = vpop.f32.mrb[10].mxu0  ;;  %v1281_v0 = vpop.f32.mrb[10].mxu1  ;;  %v3936_v2 = vld [vmem:[#allocation14 + $0x370] ss:$8 sps:$4 sm:$0xff]   ;;  %v3939_v3 = vld [vmem:[#allocation14 + $0x384] ss:$8 sps:$4 sm:$0xff]  }
 0x2fc   :  { %v1241_v54 = vpop.f32.mrb[11].mxu0  ;;  %v1282_v37 = vpop.f32.mrb[11].mxu1  ;;  %2494 = vmatprep.subr.bf16.mxu1 %v3896_v56  ;;  %2150 = vmatpush1.bf16.msra.mxu0 %v3717_v7  ;;  %v3919_v0 = vld [vmem:[#allocation14 + $0x364] ss:$8 sps:$4 sm:$0xff]  }
 0x2fd   :  { %3164 = vtanh.f32 %v1239_v25  ;;  %2151 = vmatprep.subr.bf16.mxu0 %v3720_v8  ;;  %v3931_v8 = vld [vmem:[#allocation14 + $0x374] ss:$8 sps:$4 sm:$0xff]  }
 0x2ff   :  { %2495 = vmatpush1.bf16.msra.mxu1 %v3908_v61 }
 0x300   :  { %2496 = vmatprep.subr.bf16.mxu1 %v3911_v5  ;;  %2152 = vmatpush1.bf16.msra.mxu0 %v3723_v58  ;;  %v3163_v58 = vpop.eup %3162 }
 0x301   :  { %v3922_v54 = vpop.f32.mrb[12].mxu1  ;;  %2153 = vmatprep.subr.bf16.mxu0 %v3726_v9  ;;  %v1427_v62 = vpack.c.bf16 %v3163_v58, %v3163_v58 }
 0x302   :  { %v3924_v20 = vpop.f32.mrb[13].mxu1 }
 0x303   :  { %2497 = vmatpush1.bf16.msra.mxu1 %v3916_v6  ;;  %v2306_v25 = vpop.f32.mrb[14].mxu1 }
 0x304   :  { %v2307_v7 = vpop.f32.mrb[15].mxu1  ;;  %2498 = vmatprep.subr.bf16.mxu1 %v3919_v0  ;;  %2154 = vmatpush1.bf16.msra.mxu0 %v3729_v11  ;;  %v3944_v11 = vld [vmem:[#allocation14 + $0x380] ss:$8 sps:$4 sm:$0xff]  }
 0x305   :  { %2155 = vmatprep.subr.bf16.mxu0 %v3732_v12  ;;  %v3947_v12 = vld [vmem:[#allocation14 + $0x394] ss:$8 sps:$4 sm:$0xff]   ;;  %v3960_v25 = vld [vmem:[#allocation14 + $0x3a0] ss:$8 sps:$4 sm:$0xff]  }
 0x306   :  { %v2353_v7 = vld [vmem:[#allocation6 + $0x30] sm:$0xff] }
 0x307   :  { %2499 = vmatpush1.bf16.msra.mxu1 %v3928_v41  ;;  %v3165_v9 = vpop.eup %3164 }
 0x308   :  { %2500 = vmatprep.subr.bf16.mxu1 %v3931_v8  ;;  %2156 = vmatpush1.bf16.msra.mxu0 %v3735_v15  ;;  %v1430_v37 = vpack.c.bf16 %v3165_v9, %v3165_v9  ;;  %v3952_v15 = vld [vmem:[#allocation14 + $0x390] ss:$8 sps:$4 sm:$0xff]  }
 0x309   :  { %2166 = vmatprep.subr.bf16.mxu0 %v3738_v17  ;;  %v3955_v17 = vld [vmem:[#allocation14 + $0x3a4] ss:$8 sps:$4 sm:$0xff]  }
 0x30b   :  { %2501 = vmatpush1.bf16.msra.mxu1 %v3936_v2  ;;  %2158 = vmatmul.mubr.bf16.vlgmr.msra.gmra.mrb[12].mxu0 %v1427_v62 }
 0x30c   :  { %2502 = vmatprep.subr.bf16.mxu1 %v3939_v3  ;;  %2167 = vmatpush1.bf16.msra.mxu0 %v3741_v21  ;;  %v3963_v21 = vld [vmem:[#allocation14 + $0x3b4] ss:$8 sps:$4 sm:$0xff]  }
 0x30d   :  { %2198 = vmatprep.mubr.bf16.mxu0 %v1430_v37  ;;  %2168 = vmatprep.subr.bf16.mxu0 %v3744_v23  ;;  %v3968_v23 = vld [vmem:[#allocation14 + $0x3b0] ss:$8 sps:$4 sm:$0xff]  }
 0x30f   :  { %2503 = vmatpush1.bf16.msra.mxu1 %v3944_v11 }
 0x310   :  { %2504 = vmatprep.subr.bf16.mxu1 %v3947_v12  ;;  %2169 = vmatpush1.bf16.msra.mxu0 %v3747_v24  ;;  %v3971_v24 = vld [vmem:[#allocation14 + $0x3c4] ss:$8 sps:$4 sm:$0xff]  }
 0x311   :  { %2170 = vmatprep.subr.bf16.mxu0 %v3750_v26  ;;  %v3976_v26 = vld [vmem:[#allocation14 + $0x3c0] ss:$8 sps:$4 sm:$0xff]  }
 0x313   :  { %2505 = vmatpush1.bf16.msra.mxu1 %v3952_v15 }
 0x314   :  { %2506 = vmatprep.subr.bf16.mxu1 %v3955_v17  ;;  %2171 = vmatpush1.bf16.msra.mxu0 %v3753_v27  ;;  %v3979_v27 = vld [vmem:[#allocation14 + $0x3d4] ss:$8 sps:$4 sm:$0xff]  }
 0x315   :  { %2172 = vmatprep.subr.bf16.mxu0 %v3759_v30  ;;  %v3984_v30 = vld [vmem:[#allocation14 + $0x3d0] ss:$8 sps:$4 sm:$0xff]  }
 0x317   :  { %2507 = vmatpush1.bf16.msra.mxu1 %v3960_v25 }
 0x318   :  { %2508 = vmatprep.subr.bf16.mxu1 %v3963_v21  ;;  %2173 = vmatpush1.bf16.msra.mxu0 %v3764_v32  ;;  %v3987_v32 = vld [vmem:[#allocation14 + $0x3e4] ss:$8 sps:$4 sm:$0xff]  }
 0x319   :  { %2174 = vmatprep.subr.bf16.mxu0 %v3770_v35  ;;  %v3992_v35 = vld [vmem:[#allocation14 + $0x3e0] ss:$8 sps:$4 sm:$0xff]  }
 0x31b   :  { %2509 = vmatpush1.bf16.msra.mxu1 %v3968_v23 }
 0x31c   :  { %2510 = vmatprep.subr.bf16.mxu1 %v3971_v24  ;;  %2175 = vmatpush1.bf16.msra.mxu0 %v3775_v18  ;;  %v3995_v18 = vld [vmem:[#allocation14 + $0x3f4] ss:$8 sps:$4 sm:$0xff]  }
 0x31d   :  { %2176 = vmatprep.subr.bf16.mxu0 %v3778_v29  ;;  %v4000_v29 = vld [vmem:[#allocation14 + $0x3f0] ss:$8 sps:$4 sm:$0xff]  }
 0x31f   :  { %2511 = vmatpush1.bf16.msra.mxu1 %v3976_v26 }
 0x320   :  { %2512 = vmatprep.subr.bf16.mxu1 %v3979_v27  ;;  %2177 = vmatpush1.bf16.msra.mxu0 %v3781_v31  ;;  %v2361_v31 = vpack.c.bf16 %v2353_v7, %v2353_v7 }
 0x321   :  { %2178 = vmatprep.subr.bf16.mxu0 %v3784_v33  ;;  %v458_v33 = vsub.s32 4, %v3613_v38 }
 0x323   :  { %2513 = vmatpush1.bf16.msra.mxu1 %v3984_v30 }
 0x324   :  { %2514 = vmatprep.subr.bf16.mxu1 %v3987_v32  ;;  %2179 = vmatpush1.bf16.msra.mxu0 %v3787_v34  ;;  %v470_v34 = vsub.s32 7, %v3613_v38 }
 0x325   :  { %2180 = vmatprep.subr.bf16.mxu0 %v3790_v36  ;;  %v459_v36 = vrot.slane %v3755_v28, %v458_v33 }
 0x327   :  { %2515 = vmatpush1.bf16.msra.mxu1 %v3992_v35 }
 0x328   :  { %2516 = vmatprep.subr.bf16.mxu1 %v3995_v18  ;;  %2181 = vmatpush1.bf16.msra.mxu0 %v3793_v13  ;;  %v471_v13 = vrot.slane %v3755_v28, %v470_v34 }
 0x329   :  { %2182 = vmatprep.subr.bf16.mxu0 %v3796_v40  ;;  %v1237_v40 = vadd.f32 %v3900_v39, %v459_v36 }
 0x32b   :  { %2517 = vmatpush1.bf16.msra.mxu1 %v4000_v29  ;;  %3166 = vtanh.f32 %v1237_v40 }
 0x32c   :  { %2183 = vmatpush1.bf16.msra.mxu0 %v3799_v22 }
 0x32d   :  { %2184 = vmatprep.subr.bf16.mxu0 %v3802_v1  ;;  %v1280_v1 = vadd.f32 %v3904_v4, %v471_v13 }
 0x32e   :  { %2519 = vmatmul.mubr.bf16.vlgmr.msra.gmra.mrb[16].mxu1 %v2361_v31 }
 0x32f   :  { %3168 = vtanh.f32 %v1280_v1 }
 0x330   :  { %2185 = vmatpush1.bf16.msra.mxu0 %v3807_v16 }
 0x331   :  { %2186 = vmatprep.subr.bf16.mxu0 %v3810_v14 }
 0x334   :  { %2187 = vmatpush1.bf16.msra.mxu0 %v3815_v42  ;;  %v4138_v42 = vld [vmem:[#allocation29_spill] sm:$0xff] }
 0x335   :  { %2188 = vmatprep.subr.bf16.mxu0 %v3818_v43  ;;  %v3167_v39 = vpop.eup %3166 }
 0x336   :  { %v1429_v16 = vpack.c.bf16 %v3167_v39, %v3167_v39 }
 0x338   :  { %2189 = vmatpush1.bf16.msra.mxu0 %v3823_v45 }
 0x339   :  { %2190 = vmatprep.subr.bf16.mxu0 %v3826_v46  ;;  %v3169_v22 = vpop.eup %3168 }
 0x33a   :  { %v1432_v14 = vpack.c.bf16 %v3169_v22, %v3169_v22 }
 0x33c   :  { %2191 = vmatpush1.bf16.msra.mxu0 %v3831_v47  ;;  %v4139_v47 = vld [vmem:[#allocation27_spill] sm:$0xff] }
 0x33d   :  { %2192 = vmatprep.subr.bf16.mxu0 %v3834_v48  ;;  %v4140_v48 = vld [vmem:[#allocation28_spill] sm:$0xff] }
 0x340   :  { %2193 = vmatpush1.bf16.msra.mxu0 %v3839_v49  ;;  %v4141_v49 = vmov 0  }
 0x341   :  { %2194 = vmatprep.subr.bf16.mxu0 %v3842_v50  ;;  %v4142_v50 = vld [vmem:[#allocation24_spill] sm:$0xff] }
 0x344   :  { %2195 = vmatpush1.bf16.msra.mxu0 %v3847_v10  ;;  %v158_v10 = vpack.c.bf16 %v4142_v50, %v4142_v50 }
 0x345   :  { %2196 = vmatprep.subr.bf16.mxu0 %v3850_v51  ;;  %v1423_v51 = vld [vmem:[%s4120_s12] sm:$0x3] }
 0x348   :  { %2197 = vmatpush1.bf16.msra.mxu0 %v3855_v52  ;;  %v1422_v52 = vld [vmem:[%s4119_s11] sm:$0x3]  ;;  %s3395_s11 = smov [#allocation15]  }
 0x349   :  { %2207 = vmatprep.subr.bf16.mxu0 %v3858_v53  ;;  %v2314_v53 = vunpack.c.l.bf16 %v1423_v51  ;;  %s2607_s12 = sshll.u32 %s3395_s11, 4  ;;  %s2608_s12 = int_to_ptr.vmem [resolvable:$true] %s2607_s12 }
 0x34a   :  { %s3326_s17 = scalar_lea.vmem %s2608_s12, 128  ;;  %p3331_p1 = scmp.lt.s32.totalorder %s2608_s12, %s2608_s12 }
 0x34b   :  { %2199 = vmatmul.mubr.bf16.vlgmr.msra.gmra.mrb[12].mxu0 %v1429_v16  ;;  %v2904_v16 = vld [vmem:[#allocation2] ss:$0 sm:$0xff]  ;;  %p3327_p0 = scmp.ne.s32.totalorder %s2608_s12, %s3326_s17  ;;  %p3332_p2 = scmp.lt.s32.totalorder %s3326_s17, %s3326_s17 }
 0x34c   :  { %2208 = vmatpush1.bf16.msra.mxu0 %v3863_v55  ;;  %2239 = vmatprep.mubr.bf16.mxu0 %v1432_v14  ;;  %v4143_v55 = vld [vmem:[#allocation25_spill] sm:$0xff] }
 0x34d   :  { %2209 = vmatprep.subr.bf16.mxu0 %v3866_v19  ;;  %v1437_v19 = vrot.slane %v1422_v52, %v4143_v55  ;;  %p3333_p3 = por %p3332_p2, %p3331_p1 }
 0x34f   :  { %p3334_p4 = pnand %p3333_p3, %p3327_p0 }
 0x350   :  { %2210 = vmatpush1.bf16.msra.mxu0 %v3871_v57  ;;  %v4144_v57 = vld [vmem:[#allocation26_spill] sm:$0xff] }
 0x351   :  { %2211 = vmatprep.subr.bf16.mxu0 %v3874_v59  ;;  %v1441_v59 = vrot.slane %v1422_v52, %v4144_v57 }
 0x354   :  { %2212 = vmatpush1.bf16.msra.mxu0 %v3880_v60  ;;  %v4145_v60 = vsub.s32 2, %v3613_v38 }
 0x355   :  { %2213 = vmatprep.subr.bf16.mxu0 %v4138_v42 }
 0x358   :  { %2214 = vmatpush1.bf16.msra.mxu0 %v3892_v63  ;;  %v2323_v63 = vrot.slane %v2314_v53, %v4145_v60 }
 0x359   :  { %2215 = vmatprep.subr.bf16.mxu0 %v3896_v56 }
 0x35c   :  { %2216 = vmatpush1.bf16.msra.mxu0 %v3908_v61  ;;  %v466_v61 = vsub.s32 6, %v3613_v38 }
 0x35d   :  { %2217 = vmatprep.subr.bf16.mxu0 %v3911_v5 }
 0x35e   :  { %v467_v43 = vrot.slane %v3755_v28, %v466_v61 }
 0x360   :  { %2218 = vmatpush1.bf16.msra.mxu0 %v3916_v6  ;;  %v1278_v45 = vadd.f32 %v3902_v44, %v467_v43  ;;  %v2319_v44 = vrot.slane %v2314_v53, %v4143_v55 }
 0x361   :  { %2219 = vmatprep.subr.bf16.mxu0 %v3919_v0 }
 0x362   :  { %3170 = vtanh.f32 %v1278_v45 }
 0x364   :  { %2220 = vmatpush1.bf16.msra.mxu0 %v3928_v41  ;;  %v2329_v41 = vrot.slane %v2319_v44, %v4143_v55 }
 0x365   :  { %2221 = vmatprep.subr.bf16.mxu0 %v3931_v8 }
 0x368   :  { %2222 = vmatpush1.bf16.msra.mxu0 %v3936_v2  ;;  %v2333_v2 = vrot.slane %v2323_v63, %v4143_v55 }
 0x369   :  { %2223 = vmatprep.subr.bf16.mxu0 %v3939_v3 }
 0x36c   :  { %2224 = vmatpush1.bf16.msra.mxu0 %v3944_v11  ;;  %v3171_v28 = vpop.eup %3170 }
 0x36d   :  { %2225 = vmatprep.subr.bf16.mxu0 %v3947_v12  ;;  %v1431_v46 = vpack.c.bf16 %v3171_v28, %v3171_v28 }
 0x370   :  { %2226 = vmatpush1.bf16.msra.mxu0 %v3952_v15 }
 0x371   :  { %2227 = vmatprep.subr.bf16.mxu0 %v3955_v17 }
 0x374   :  { %2228 = vmatpush1.bf16.msra.mxu0 %v3960_v25 }
 0x375   :  { %2229 = vmatprep.subr.bf16.mxu0 %v3963_v21 }
 0x378   :  { %2230 = vmatpush1.bf16.msra.mxu0 %v3968_v23 }
 0x379   :  { %2231 = vmatprep.subr.bf16.mxu0 %v3971_v24 }
 0x37c   :  { %2232 = vmatpush1.bf16.msra.mxu0 %v3976_v26 }
 0x37d   :  { %2233 = vmatprep.subr.bf16.mxu0 %v3979_v27 }
 0x380   :  { %2234 = vmatpush1.bf16.msra.mxu0 %v3984_v30 }
 0x381   :  { %2235 = vmatprep.subr.bf16.mxu0 %v3987_v32 }
 0x384   :  { %2236 = vmatpush1.bf16.msra.mxu0 %v3992_v35 }
 0x385   :  { %2237 = vmatprep.subr.bf16.mxu0 %v3995_v18 }
 0x388   :  { %2238 = vmatpush1.bf16.msra.mxu0 %v4000_v29 }
 0x389   :  { %2905 = vmatprep.subr.msk.bf16.mxu0 %vm309_vm0, %v4139_v47 }
 0x38b   :  { %2240 = vmatmul.mubr.bf16.vlgmr.msra.gmra.mrb[12].mxu0 %v1431_v46 }
 0x38c   :  { %2537 = vmatpush1.bf16.msra.mxu0 %v4140_v48  ;;  %2568 = vmatprep.mubr.bf16.mxu0 %v4141_v49 }
 0x393   :  { %2906 = vmatmul.mubr.msk.bf16.vlgmr.msra.gmra.mrb[16].mxu0 %vm305_vm3, %v158_v10 }
 0x401   :  { %v2520_v56 = vpop.f32.mrb[16].mxu1 }
 0x402   :  { %v2909_v4 = vadd.f32 %v2520_v56, %v1437_v19  ;;  %v2522_v5 = vpop.f32.mrb[17].mxu1 }
 0x403   :  { %v2910_v6 = vadd.f32 %v2522_v5, %v1441_v59  ;;  %v2524_v0 = vpop.f32.mrb[18].mxu1 }
 0x404   :  { %v2529_v8 = vmul.f32 0.2, %v2909_v4  ;;  %v2525_v58 = vpop.f32.mrb[19].mxu1  ;;  %vm2527_vm5 = vcmp.gt.f32.partialorder %v2909_v4, 0.0 }
 0x405   :  { %v2530_v9 = vmul.f32 0.2, %v2910_v6  ;;  %vm2528_vm6 = vcmp.gt.f32.partialorder %v2910_v6, 0.0 }
 0x406   :  { %v2531_v3 = vsel %vm2527_vm5, %v2909_v4, %v2529_v8 }
 0x407   :  { %v2582_v62 = vmul.f32 %v2531_v3, %v2329_v41  ;;  %v2532_v37 = vsel %vm2528_vm6, %v2910_v6, %v2530_v9 }
 0x408   :  { %v2583_v11 = vmul.f32 %v2532_v37, %v2333_v2 }
 0x40a   :  { %v2584_v38 = vadd.f32 %v2583_v11, %v2582_v62 }
 0x45e   :  { %v2241_v12 = vpop.f32.mrb[12].mxu0 }
 0x45f   :  { %v2907_v15 = vadd.f32 %v2241_v12, %v1437_v19  ;;  %v2243_v17 = vpop.f32.mrb[13].mxu0 }
 0x460   :  { %v2908_v25 = vadd.f32 %v2243_v17, %v1441_v59  ;;  %v2245_v21 = vpop.f32.mrb[14].mxu0 }
 0x461   :  { %vm2248_vm7 = vcmp.gt.f32.partialorder %v2907_v15, 0.0  ;;  %v2250_v23 = vmul.f32 0.2, %v2907_v15  ;;  %v2246_v24 = vpop.f32.mrb[15].mxu0 }
 0x462   :  { %vm2249_vm8 = vcmp.gt.f32.partialorder %v2908_v25, 0.0  ;;  %v2251_v26 = vmul.f32 0.2, %v2908_v25 }
 0x463   :  { %v2252_v27 = vsel %vm2248_vm7, %v2907_v15, %v2250_v23 }
 0x464   :  { %v2253_v30 = vsel %vm2249_vm8, %v2908_v25, %v2251_v26  ;;  %v2309_v32 = vmul.f32 %v3922_v54, %v2252_v27  ;;  %v2334_v35 = vmul.f32 %v2329_v41, %v2252_v27 }
 0x465   :  { %v2310_v18 = vmul.f32 %v3924_v20, %v2253_v30  ;;  %v2335_v29 = vmul.f32 %v2333_v2, %v2253_v30 }
 0x466   :  { %v2570_v7 = vpop.f32.mrb[16].mxu0 }
 0x467   :  { %v2577_v31 = vmul.f32 %v2570_v7, %v2531_v3  ;;  %v2572_v33 = vpop.f32.mrb[17].mxu0  ;;  %v2311_v34 = vadd.f32 %v2310_v18, %v2309_v32  ;;  %v2336_v36 = vadd.f32 %v2335_v29, %v2334_v35 }
 0x468   :  { %v2578_v13 = vmul.f32 %v2572_v33, %v2532_v37  ;;  %v2574_v40 = vpop.f32.mrb[18].mxu0 }
 0x469   :  { %2312 = vadd.xlane.f32.xlu1 %v2311_v34  ;;  %v2575_v1 = vpop.f32.mrb[19].mxu0 }
 0x46a   :  { %v2579_v39 = vadd.f32 %v2578_v13, %v2577_v31 }
 0x46c   :  { %2580 = vadd.xlane.f32.xlu0 %v2579_v39 }
 0x46d   :  { %2337 = vadd.xlane.f32.xlu1 %v2336_v36 }
 0x471   :  { %2585 = vadd.xlane.f32.xlu1 %v2584_v38 }
 0x4f6   :  { %v2313_v22 = vpop.xlane.xlu1 %2312 }
 0x4f9   :  { %v2581_v20 = vpop.xlane.xlu0 %2580 }
 0x4fa   :  { %v2338_v54 = vpop.xlane.xlu1 %2337 }
 0x4fb   :  { %v2339_v14 = vadd.f32 %v2338_v54, %v2313_v22 }
 0x4fd   :  { %v2346_v42 = vadd.f32 %v2904_v16, %v2339_v14 }
 0x4fe   :  { %v2586_v61 = vpop.xlane.xlu1 %2585 }
 0x4ff   :  { %v2587_v43 = vadd.f32 %v2586_v61, %v2581_v20  ;;  %2591 = vperm.xlu1 %2951, %v2346_v42  }
 0x501   :  { %v2588_v45 = vadd.f32 %v2904_v16, %v2587_v43 }
 0x503   :  { %2597 = vperm.xlu1 %2951, %v2588_v45  }
 0x57e   :  { %v2592_v28 = vpop.permute.xlu1 %2591 }
 0x57f   :  { %2594 = vst [vmem:[#allocation15] sm:$0xff] %v2592_v28 }
 0x580   :  { %3337 = shalt.err (!%p3334_p4)
}
 0x581   :  { %s3338_s7 = scalar_lea.hbm %s4122_s14, 128 }
 0x582   :  { %p3339_p5 = scmp.ne.s32.totalorder %s4122_s14, %s3338_s7  ;;  %p3342_p6 = scmp.lt.u32.totalorder %s3338_s7, %s4122_s14 }
 0x584   :  { %p3344_p7 = pnand %p3342_p6, %p3339_p5 }
 0x586   :  { %3347 = shalt.err (!%p3344_p7)
}
 0x587   :  { %2610 = dma.vmem_to_hbm [thread:$0]  %s2608_s12, 128, %s4122_s14, [#allocation5]   ;;  %v2598_v46 = vpop.permute.xlu1 %2597 }
 0x588   :  { %2600 = vst [vmem:[#allocation16] sm:$0xff] %v2598_v46  ;;  %s3348_s22 = scalar_lea.vmem %s2618_s16, 128  ;;  %p3353_p9 = scmp.lt.s32.totalorder %s2618_s16, %s2618_s16 }
 0x589   :  { %p3349_p8 = scmp.ne.s32.totalorder %s2618_s16, %s3348_s22  ;;  %p3354_p10 = scmp.lt.s32.totalorder %s3348_s22, %s3348_s22 }
 0x58b   :  { %p3355_p11 = por %p3354_p10, %p3353_p9 }
 0x58d   :  { %p3356_p12 = pnand %p3355_p11, %p3349_p8 }
 0x58f   :  { %3359 = shalt.err (!%p3356_p12)
}
 0x590   :  { %s3360_s19 = scalar_lea.hbm %s4123_s15, 128 }
 0x591   :  { %p3361_p13 = scmp.ne.s32.totalorder %s4123_s15, %s3360_s19  ;;  %p3364_p0 = scmp.lt.u32.totalorder %s3360_s19, %s4123_s15 }
 0x593   :  { %p3366_p1 = pnand %p3364_p0, %p3361_p13 }
 0x595   :  { %3369 = shalt.err (!%p3366_p1)
}
 0x596   :  { %2620 = dma.vmem_to_hbm [thread:$0]  %s2618_s16, 128, %s4123_s15, [#allocation17]  }
 0x597   :  { %3378 = dma.done.wait [#allocation5], 128  }
 0x598   :  { %3379 = vsyncadd [#allocation5], 4294967168 }
 0x599   :  { %3380 = dma.done.wait [#allocation17], 128  }
 0x59a   :  { %3381 = vsyncadd [#allocation17], 4294967168 }
 0x59b   :  { %2627 = vsyncpa [#allocation4], 1 }
 0x59c   :  { %2628 = vsyncpa [#allocation7], 1 }
 0x59d   :  { %2629 = vsyncpa [#allocation10], 1 }
 0x59e   :  { %2630 = vsyncpa [#allocation13], 1 }
 0x59f   :  { %2631 = vsyncpa [#allocation5], 1 }
 0x5a0   :  { %2632 = vsyncpa [#allocation17], 1 }

</bundles_post_ra>
